<compile_context>
chip_gen: v7x
topology: tpu7x:2x2x1
jax: 0.10.0
libtpu: 0.0.40
codegen_flags: <defaults>
</compile_context>

<pallas_src>
import numpy as np
import jax
import jax.numpy as jnp
from jax.experimental import pallas as pl
from jax.experimental.pallas import tpu as pltpu


def _round_up(x, m):
    return ((x + m - 1) // m) * m


# ----------------------------------------------------------------------------
# Kernel
# ----------------------------------------------------------------------------
def _make_fused_lstm_kernel(b_pad: int, t_pad: int, t_orig: int, pad: int,
                            hidden_dim: int, gp: int):
    """Builds the Pallas kernel body. All loop bounds / offsets are static."""
    B8, T, S, P, H, GP = b_pad, t_pad, t_orig, pad, hidden_dim, gp

    # Which boundary-step kinds exist (trace-time decision, no runtime masks
    # on the common path).
    has_f_only = any((s < S) and (s < P) for s in range(T))
    has_b_only = any((s >= S) and (s >= P) for s in range(T))

    def kernel(x2_ref,      # (T*B8, 2D)   row t*B8+b = [x[b,t,:], x[b,T-1-t,:]]
               wih_ref,     # (2D, 4*GP)   fused, gate-permuted, lane-padded W_ih
               whh_ref,     # (GP, 4*GP)   block-diagonal fused W_hh (zero-padded)
               b_ref,       # (1, 4*GP)    fused bias (b_ih + b_hh per direction)
               wred_ref,    # (GP, H)      reduce_dim weight (transposed, padded)
               bred_ref,    # (1, H)       reduce_dim bias
               out_ref,     # (B8, H)
               gx_ref):     # VMEM scratch (T*B8, 4*GP)
        # One MXU matmul covers the input contribution of every timestep for
        # BOTH directions (bwd gate columns see the time-reversed x half).
        gx = jnp.dot(x2_ref[...], wih_ref[...],
                     preferred_element_type=jnp.float32) + b_ref[...]
        gx_ref[...] = gx          # park in VMEM; per-step reads are 8-row aligned

        whh = whh_ref[...]                                  # (GP, 4*GP) f32
        h = jnp.zeros((B8, GP), jnp.float32)                # [h_fwd|h_bwd|0pad]
        c = jnp.zeros((B8, GP), jnp.float32)
        acc = jnp.zeros((B8, GP), jnp.float32)              # whole-vreg accumulator

        if has_f_only or has_b_only:
            lane_ids = jax.lax.broadcasted_iota(jnp.int32, (B8, GP), 1)
            mask_f = (lane_ids < H).astype(jnp.float32)                    # fwd lanes
            mask_b = ((lane_ids >= H) & (lane_ids < 2 * H)).astype(jnp.float32)

        # Fully-unrolled fused recurrence: step s advances the forward chain at
        # time s and the backward chain at time T-1-s simultaneously.
        # TODO(synk): for long T_pad switch to lax.fori_loop(..., unroll=4..8)
        # with runtime keep-masks; at T_pad=8 the full unroll is the right choice.
        for s in range(T):
            g = gx_ref[s * B8:(s + 1) * B8, :] + jnp.dot(
                h, whh, preferred_element_type=jnp.float32)   # (B8, 4*GP)
            # 128-aligned gate groups: one sigmoid over i|f|o, one tanh over g.
            sig = jax.nn.sigmoid(g[:, 0:3 * GP])
            gg = jnp.tanh(g[:, 3 * GP:4 * GP])
            i_cat = sig[:, 0:GP]
            f_cat = sig[:, GP:2 * GP]
            o_cat = sig[:, 2 * GP:3 * GP]
            c = f_cat * c + i_cat * gg
            h = o_cat * jnp.tanh(c)
            # Trace-time gating: fwd output at time s kept iff s < S; bwd output
            # corresponds to time T-1-s, kept iff s >= pad.  Interior steps do a
            # single whole-vreg add; boundary steps use a constant lane mask.
            keep_f = s < S
            keep_b = s >= P
            if keep_f and keep_b:
                acc = acc + h
            elif keep_f:
                acc = acc + h * mask_f
            elif keep_b:
                acc = acc + h * mask_b

        # mean over the original (unpadded) timesteps, then reduce_dim Linear.
        # (reduce_dim is linear, so reduce(mean(h)) == mean(reduce(h)).)
        mean_cat = acc * jnp.float32(1.0 / S)
        red = jnp.dot(mean_cat, wred_ref[...],
                      preferred_element_type=jnp.float32) + bred_ref[...]
        out_ref[...] = red.astype(out_ref.dtype)

    return kernel


# ----------------------------------------------------------------------------
# Host-side weight preparation
# ----------------------------------------------------------------------------
def _permute_ifgo_to_ifog(w, H):
    """Reorder gate columns from PyTorch [i, f, g, o] to [i, f, o, g]."""
    return jnp.concatenate(
        [w[..., 0:2 * H], w[..., 3 * H:4 * H], w[..., 2 * H:3 * H]], axis=-1)


def _fuse_params_padded(params, input_dim, hidden_dim, gp):
    """Fuse fwd/bwd weights into 128-lane-padded gate groups.

    Gate group k (width GP): cols [0:H]=fwd gate k, [H:2H]=bwd gate k, rest 0.
    Note: biases are assumed to already be b_ih + b_hh per direction.
    """
    D, H, GP = input_dim, hidden_dim, gp
    wih_f = _permute_ifgo_to_ifog(params["wih_f"], H)   # (D, 4H)
    wih_b = _permute_ifgo_to_ifog(params["wih_b"], H)
    whh_f = _permute_ifgo_to_ifog(params["whh_f"], H)   # (H, 4H)
    whh_b = _permute_ifgo_to_ifog(params["whh_b"], H)
    b_f = _permute_ifgo_to_ifog(params["b_f"], H)        # (1, 4H)
    b_b = _permute_ifgo_to_ifog(params["b_b"], H)

    wih_blocks, whh_blocks, b_blocks = [], [], []
    for k in range(4):
        sl = slice(k * H, (k + 1) * H)

        blk = jnp.zeros((2 * D, GP), jnp.float32)
        blk = blk.at[0:D, 0:H].set(wih_f[:, sl])          # fwd x -> fwd gate cols
        blk = blk.at[D:2 * D, H:2 * H].set(wih_b[:, sl])  # reversed x -> bwd cols
        wih_blocks.append(blk)

        blk = jnp.zeros((GP, GP), jnp.float32)            # block-diagonal W_hh
        blk = blk.at[0:H, 0:H].set(whh_f[:, sl])
        blk = blk.at[H:2 * H, H:2 * H].set(whh_b[:, sl])
        whh_blocks.append(blk)

        blk = jnp.zeros((1, GP), jnp.float32)
        blk = blk.at[:, 0:H].set(b_f[:, sl])
        blk = blk.at[:, H:2 * H].set(b_b[:, sl])
        b_blocks.append(blk)

    wih_fused = jnp.concatenate(wih_blocks, axis=1)       # (2D, 4*GP)
    whh_fused = jnp.concatenate(whh_blocks, axis=1)       # (GP, 4*GP)
    b_fused = jnp.concatenate(b_blocks, axis=1)           # (1, 4*GP)
    wred_pad = jnp.zeros((GP, H), jnp.float32).at[0:2 * H, :].set(params["wred"])
    return wih_fused, whh_fused, b_fused, wred_pad


# ----------------------------------------------------------------------------
# Wrapper reproducing TemporalMatrixLSTM.forward (bidirectional=True)
# ----------------------------------------------------------------------------
def temporal_matrix_lstm(temporal_embeddings, params, hidden_dim,
                         mxu_dtype=jnp.float32):
    B, S, D = temporal_embeddings.shape
    H = hidden_dim
    # PyTorch padding quirk: pad seq len up to a multiple of batch size.
    pad = (B - S % B) if (S % B != 0) else 0
    T_pad = S + pad
    B8 = max(8, _round_up(B, 8))                 # sublane-aligned batch rows
    GP = max(128, _round_up(2 * H, 128))         # 128-lane-padded gate group

    x = temporal_embeddings.astype(jnp.float32)
    if pad > 0:
        x = jnp.concatenate([x, jnp.zeros((B, pad, D), jnp.float32)], axis=1)

    # Lane-dense, time-major 2-D input prepared outside the kernel:
    # row t*B8+b = [x[b, t, :], x[b, T_pad-1-t, :]]  (bwd half time-reversed),
    # rows b >= B are zero batch padding (discarded at the end).
    # TODO(synk): for long sequences avoid this extra HBM pass by feeding x via
    # two time-indexed BlockSpecs (forward / reversed) instead of materializing x2.
    x_tbd = jnp.transpose(x, (1, 0, 2))                       # (T, B, D)
    x2 = jnp.concatenate([x_tbd, x_tbd[::-1]], axis=-1)       # (T, B, 2D)
    if B8 > B:
        x2 = jnp.pad(x2, ((0, 0), (0, B8 - B), (0, 0)))
    x2 = x2.reshape(T_pad * B8, 2 * D).astype(mxu_dtype)

    wih_fused, whh_fused, b_fused, wred_pad = _fuse_params_padded(params, D, H, GP)
    wih_fused = wih_fused.astype(mxu_dtype)     # MXU operand; recurrence stays f32

    kernel = _make_fused_lstm_kernel(B8, T_pad, S, pad, H, GP)
    vmem = pl.BlockSpec(memory_space=pltpu.MemorySpace.VMEM)

    # TODO(synk): at production shapes (large B*T) add a grid: chunk the time
    # axis ("arbitrary") so gx fits v7x's 64 MiB VMEM, and shard independent
    # sequences across a "parallel" leading axis to use both v7x TensorCores.
    out = pl.pallas_call(
        kernel,
        out_shape=jax.ShapeDtypeStruct((B8, H), jnp.float32),
        in_specs=[vmem] * 6,
        out_specs=vmem,
        scratch_shapes=[pltpu.VMEM((T_pad * B8, 4 * GP), jnp.float32)],
    )(x2, wih_fused, whh_fused, b_fused, wred_pad, params["bred"])
    return out[:B]


# ----------------------------------------------------------------------------
# Pure-JAX reference mirroring the PyTorch forward exactly
# ----------------------------------------------------------------------------
def _reference(temporal_embeddings, params, hidden_dim):
    B, S, D = temporal_embeddings.shape
    H = hidden_dim
    pad = (B - S % B) if (S % B != 0) else 0
    x = temporal_embeddings
    if pad > 0:
        x = jnp.concatenate([x, jnp.zeros((B, pad, D), x.dtype)], axis=1)
    T = S + pad

    def run_dir(wih, whh, b, reverse):
        h = jnp.zeros((B, H), jnp.float32)
        c = jnp.zeros((B, H), jnp.float32)
        order = range(T - 1, -1, -1) if reverse else range(T)
        outs = [None] * T
        for t in order:
            g = x[:, t, :] @ wih + h @ whh + b
            i = jax.nn.sigmoid(g[:, 0:H])
            f = jax.nn.sigmoid(g[:, H:2 * H])
            gg = jnp.tanh(g[:, 2 * H:3 * H])
            o = jax.nn.sigmoid(g[:, 3 * H:4 * H])
            c = f * c + i * gg
            h = o * jnp.tanh(c)
            outs[t] = h
        return jnp.stack(outs, axis=1)        # (B, T, H)

    out_f = run_dir(params["wih_f"], params["whh_f"], params["b_f"][0], False)
    out_b = run_dir(params["wih_b"], params["whh_b"], params["b_b"][0], True)
    out = jnp.concatenate([out_f, out_b], axis=-1)     # (B, T, 2H)
    if pad > 0:
        out = out[:, :-pad]
    out = out @ params["wred"] + params["bred"][0]     # reduce_dim
    return jnp.mean(out, axis=1)


if __name__ == "__main__":
    # Small shapes consistent with the module:
    #   batch=2, seq=7 (forces padding to 8), input_dim=8, hidden_dim=32,
    #   bidirectional=True.
    B, S, D, H = 2, 7, 8, 32
    key = jax.random.PRNGKey(0)
    ks = jax.random.split(key, 12)
    bound = 1.0 / np.sqrt(H)   # PyTorch LSTM default init scale

    def u(k, shape):
        return jax.random.uniform(k, shape, jnp.float32, -bound, bound)

    params = {
        # forward direction (stored transposed vs. PyTorch: (D,4H), (H,4H)),
        # gate column order [i, f, g, o] like nn.LSTM; bias = b_ih + b_hh.
        "wih_f": u(ks[0], (D, 4 * H)),
        "whh_f": u(ks[1], (H, 4 * H)),
        "b_f": (u(ks[2], (4 * H,)) + u(ks[3], (4 * H,))).reshape(1, 4 * H),
        # backward direction
        "wih_b": u(ks[4], (D, 4 * H)),
        "whh_b": u(ks[5], (H, 4 * H)),
        "b_b": (u(ks[6], (4 * H,)) + u(ks[7], (4 * H,))).reshape(1, 4 * H),
        # reduce_dim Linear(2H -> H), stored transposed: (2H, H)
        "wred": u(ks[8], (2 * H, H)),
        "bred": u(ks[9], (H,)).reshape(1, H),
    }

    temporal_embeddings = jax.random.normal(ks[10], (B, S, D), jnp.float32)

    ref = jax.block_until_ready(_reference(temporal_embeddings, params, H))

    # f32 MXU operands (exact semantics check).
    out_f32 = jax.block_until_ready(
        temporal_matrix_lstm(temporal_embeddings, params, H,
                             mxu_dtype=jnp.float32))
    assert out_f32.shape == (B, H)
    np.testing.assert_allclose(np.asarray(out_f32), np.asarray(ref),
                               rtol=1e-3, atol=1e-3)

    # bf16 MXU operands for the one-shot input matmul (gate math stays f32).
    out_bf16 = jax.block_until_ready(
        temporal_matrix_lstm(temporal_embeddings, params, H,
                             mxu_dtype=jnp.bfloat16))
    np.testing.assert_allclose(np.asarray(out_bf16), np.asarray(ref),
                               rtol=5e-3, atol=5e-3)

    print("KERNEL_OK")
</pallas_src>

<mosaic_0001>
module attributes {stable_mosaic.version = 11 : i64} {
  func.func @kernel(%arg0: memref<64x16xf32, #tpu.memory_space<vmem>>, %arg1: memref<16x512xf32, #tpu.memory_space<vmem>>, %arg2: memref<128x512xf32, #tpu.memory_space<vmem>>, %arg3: memref<1x512xf32, #tpu.memory_space<vmem>>, %arg4: memref<128x32xf32, #tpu.memory_space<vmem>>, %arg5: memref<1x32xf32, #tpu.memory_space<vmem>>, %arg6: memref<8x32xf32, #tpu.memory_space<vmem>>, %arg7: memref<64x512xf32, #tpu.memory_space<vmem>>) attributes {dimension_semantics = [], scalar_prefetch = 0 : i64, scratch_operands = 1 : i64, tpu.core_type = #tpu.core_type<tc>} {
    %c0 = arith.constant 0 : index
    %c0_0 = arith.constant 0 : index
    %0 = vector.load %arg0[%c0, %c0_0] : memref<64x16xf32, #tpu.memory_space<vmem>>, vector<64x16xf32>
    %c0_1 = arith.constant 0 : index
    %c0_2 = arith.constant 0 : index
    %1 = vector.load %arg1[%c0_1, %c0_2] : memref<16x512xf32, #tpu.memory_space<vmem>>, vector<16x512xf32>
    %cst = arith.constant dense<0.000000e+00> : vector<64x512xf32>
    %2 = tpu.matmul %0, %1, %cst {dimension_numbers = #tpu.dot_dimension_numbers<[1], [0], [0], [1], [0, 0, 1, 1], [], []>} : vector<64x16xf32>, vector<16x512xf32>, vector<64x512xf32> -> vector<64x512xf32>
    %c0_3 = arith.constant 0 : index
    %c0_4 = arith.constant 0 : index
    %3 = vector.load %arg3[%c0_3, %c0_4] : memref<1x512xf32, #tpu.memory_space<vmem>>, vector<1x512xf32>
    %4 = vector.broadcast %3 : vector<1x512xf32> to vector<64x512xf32>
    %5 = arith.addf %2, %4 : vector<64x512xf32>
    %c0_5 = arith.constant 0 : index
    %c0_6 = arith.constant 0 : index
    %6 = vector.load %arg7[%c0_5, %c0_6] : memref<64x512xf32, #tpu.memory_space<vmem>>, vector<64x512xf32>
    tpu.vector_store %arg7[%c0_5, %c0_6], %5 {strides = array<i32>} : memref<64x512xf32, #tpu.memory_space<vmem>>, vector<64x512xf32>,
    %c0_7 = arith.constant 0 : index
    %c0_8 = arith.constant 0 : index
    %7 = vector.load %arg2[%c0_7, %c0_8] : memref<128x512xf32, #tpu.memory_space<vmem>>, vector<128x512xf32>
    %cst_9 = arith.constant 0.000000e+00 : f32
    %8 = vector.broadcast %cst_9 : f32 to vector<8x128xf32>
    %cst_10 = arith.constant 0.000000e+00 : f32
    %9 = vector.broadcast %cst_10 : f32 to vector<8x128xf32>
    %cst_11 = arith.constant 0.000000e+00 : f32
    %10 = vector.broadcast %cst_11 : f32 to vector<8x128xf32>
    %11 = tpu.iota {dimensions = array<i32: 1>} : vector<8x128xi32>
    %c32_i32 = arith.constant 32 : i32
    %12 = vector.broadcast %c32_i32 : i32 to vector<8x128xi32>
    %13 = arith.cmpi slt, %11, %12 : vector<8x128xi32>
    %14 = arith.extui %13 : vector<8x128xi1> to vector<8x128xi32>
    %15 = arith.sitofp %14 : vector<8x128xi32> to vector<8x128xf32>
    %c32_i32_12 = arith.constant 32 : i32
    %16 = vector.broadcast %c32_i32_12 : i32 to vector<8x128xi32>
    %17 = arith.cmpi sge, %11, %16 : vector<8x128xi32>
    %c64_i32 = arith.constant 64 : i32
    %18 = vector.broadcast %c64_i32 : i32 to vector<8x128xi32>
    %19 = arith.cmpi slt, %11, %18 : vector<8x128xi32>
    %20 = arith.andi %17, %19 : vector<8x128xi1>
    %21 = arith.extui %20 : vector<8x128xi1> to vector<8x128xi32>
    %22 = arith.sitofp %21 : vector<8x128xi32> to vector<8x128xf32>
    %c0_13 = arith.constant 0 : index
    %c0_14 = arith.constant 0 : index
    %23 = vector.load %arg7[%c0_13, %c0_14] : memref<64x512xf32, #tpu.memory_space<vmem>>, vector<8x512xf32>
    %cst_15 = arith.constant dense<0.000000e+00> : vector<8x512xf32>
    %24 = tpu.matmul %8, %7, %cst_15 {dimension_numbers = #tpu.dot_dimension_numbers<[1], [0], [0], [1], [0, 0, 1, 1], [], []>} : vector<8x128xf32>, vector<128x512xf32>, vector<8x512xf32> -> vector<8x512xf32>
    %25 = arith.addf %23, %24 : vector<8x512xf32>
    %26 = vector.extract_strided_slice %25 {offsets = [0, 0], sizes = [8, 384], strides = [1, 1]} : vector<8x512xf32> to vector<8x384xf32>
    %27 = arith.negf %26 : vector<8x384xf32>
    %28 = math.exp %27 : vector<8x384xf32>
    %cst_16 = arith.constant 1.000000e+00 : f32
    %29 = vector.broadcast %cst_16 : f32 to vector<8x384xf32>
    %30 = arith.addf %29, %28 : vector<8x384xf32>
    %31 = arith.divf %29, %30 : vector<8x384xf32>
    %32 = vector.extract_strided_slice %25 {offsets = [0, 384], sizes = [8, 128], strides = [1, 1]} : vector<8x512xf32> to vector<8x128xf32>
    %33 = math.tanh %32 : vector<8x128xf32>
    %34 = vector.extract_strided_slice %31 {offsets = [0, 0], sizes = [8, 128], strides = [1, 1]} : vector<8x384xf32> to vector<8x128xf32>
    %35 = vector.extract_strided_slice %31 {offsets = [0, 128], sizes = [8, 128], strides = [1, 1]} : vector<8x384xf32> to vector<8x128xf32>
    %36 = vector.extract_strided_slice %31 {offsets = [0, 256], sizes = [8, 128], strides = [1, 1]} : vector<8x384xf32> to vector<8x128xf32>
    %37 = arith.mulf %35, %9 : vector<8x128xf32>
    %38 = arith.mulf %34, %33 : vector<8x128xf32>
    %39 = arith.addf %37, %38 : vector<8x128xf32>
    %40 = math.tanh %39 : vector<8x128xf32>
    %41 = arith.mulf %36, %40 : vector<8x128xf32>
    %42 = arith.mulf %41, %15 : vector<8x128xf32>
    %43 = arith.addf %10, %42 : vector<8x128xf32>
    %c8 = arith.constant 8 : index
    %c0_17 = arith.constant 0 : index
    %44 = vector.load %arg7[%c8, %c0_17] : memref<64x512xf32, #tpu.memory_space<vmem>>, vector<8x512xf32>
    %cst_18 = arith.constant dense<0.000000e+00> : vector<8x512xf32>
    %45 = tpu.matmul %41, %7, %cst_18 {dimension_numbers = #tpu.dot_dimension_numbers<[1], [0], [0], [1], [0, 0, 1, 1], [], []>} : vector<8x128xf32>, vector<128x512xf32>, vector<8x512xf32> -> vector<8x512xf32>
    %46 = arith.addf %44, %45 : vector<8x512xf32>
    %47 = vector.extract_strided_slice %46 {offsets = [0, 0], sizes = [8, 384], strides = [1, 1]} : vector<8x512xf32> to vector<8x384xf32>
    %48 = arith.negf %47 : vector<8x384xf32>
    %49 = math.exp %48 : vector<8x384xf32>
    %cst_19 = arith.constant 1.000000e+00 : f32
    %50 = vector.broadcast %cst_19 : f32 to vector<8x384xf32>
    %51 = arith.addf %50, %49 : vector<8x384xf32>
    %52 = arith.divf %50, %51 : vector<8x384xf32>
    %53 = vector.extract_strided_slice %46 {offsets = [0, 384], sizes = [8, 128], strides = [1, 1]} : vector<8x512xf32> to vector<8x128xf32>
    %54 = math.tanh %53 : vector<8x128xf32>
    %55 = vector.extract_strided_slice %52 {offsets = [0, 0], sizes = [8, 128], strides = [1, 1]} : vector<8x384xf32> to vector<8x128xf32>
    %56 = vector.extract_strided_slice %52 {offsets = [0, 128], sizes = [8, 128], strides = [1, 1]} : vector<8x384xf32> to vector<8x128xf32>
    %57 = vector.extract_strided_slice %52 {offsets = [0, 256], sizes = [8, 128], strides = [1, 1]} : vector<8x384xf32> to vector<8x128xf32>
    %58 = arith.mulf %56, %39 : vector<8x128xf32>
    %59 = arith.mulf %55, %54 : vector<8x128xf32>
    %60 = arith.addf %58, %59 : vector<8x128xf32>
    %61 = math.tanh %60 : vector<8x128xf32>
    %62 = arith.mulf %57, %61 : vector<8x128xf32>
    %63 = arith.addf %43, %62 : vector<8x128xf32>
    %c16 = arith.constant 16 : index
    %c0_20 = arith.constant 0 : index
    %64 = vector.load %arg7[%c16, %c0_20] : memref<64x512xf32, #tpu.memory_space<vmem>>, vector<8x512xf32>
    %cst_21 = arith.constant dense<0.000000e+00> : vector<8x512xf32>
    %65 = tpu.matmul %62, %7, %cst_21 {dimension_numbers = #tpu.dot_dimension_numbers<[1], [0], [0], [1], [0, 0, 1, 1], [], []>} : vector<8x128xf32>, vector<128x512xf32>, vector<8x512xf32> -> vector<8x512xf32>
    %66 = arith.addf %64, %65 : vector<8x512xf32>
    %67 = vector.extract_strided_slice %66 {offsets = [0, 0], sizes = [8, 384], strides = [1, 1]} : vector<8x512xf32> to vector<8x384xf32>
    %68 = arith.negf %67 : vector<8x384xf32>
    %69 = math.exp %68 : vector<8x384xf32>
    %cst_22 = arith.constant 1.000000e+00 : f32
    %70 = vector.broadcast %cst_22 : f32 to vector<8x384xf32>
    %71 = arith.addf %70, %69 : vector<8x384xf32>
    %72 = arith.divf %70, %71 : vector<8x384xf32>
    %73 = vector.extract_strided_slice %66 {offsets = [0, 384], sizes = [8, 128], strides = [1, 1]} : vector<8x512xf32> to vector<8x128xf32>
    %74 = math.tanh %73 : vector<8x128xf32>
    %75 = vector.extract_strided_slice %72 {offsets = [0, 0], sizes = [8, 128], strides = [1, 1]} : vector<8x384xf32> to vector<8x128xf32>
    %76 = vector.extract_strided_slice %72 {offsets = [0, 128], sizes = [8, 128], strides = [1, 1]} : vector<8x384xf32> to vector<8x128xf32>
    %77 = vector.extract_strided_slice %72 {offsets = [0, 256], sizes = [8, 128], strides = [1, 1]} : vector<8x384xf32> to vector<8x128xf32>
    %78 = arith.mulf %76, %60 : vector<8x128xf32>
    %79 = arith.mulf %75, %74 : vector<8x128xf32>
    %80 = arith.addf %78, %79 : vector<8x128xf32>
    %81 = math.tanh %80 : vector<8x128xf32>
    %82 = arith.mulf %77, %81 : vector<8x128xf32>
    %83 = arith.addf %63, %82 : vector<8x128xf32>
    %c24 = arith.constant 24 : index
    %c0_23 = arith.constant 0 : index
    %84 = vector.load %arg7[%c24, %c0_23] : memref<64x512xf32, #tpu.memory_space<vmem>>, vector<8x512xf32>
    %cst_24 = arith.constant dense<0.000000e+00> : vector<8x512xf32>
    %85 = tpu.matmul %82, %7, %cst_24 {dimension_numbers = #tpu.dot_dimension_numbers<[1], [0], [0], [1], [0, 0, 1, 1], [], []>} : vector<8x128xf32>, vector<128x512xf32>, vector<8x512xf32> -> vector<8x512xf32>
    %86 = arith.addf %84, %85 : vector<8x512xf32>
    %87 = vector.extract_strided_slice %86 {offsets = [0, 0], sizes = [8, 384], strides = [1, 1]} : vector<8x512xf32> to vector<8x384xf32>
    %88 = arith.negf %87 : vector<8x384xf32>
    %89 = math.exp %88 : vector<8x384xf32>
    %cst_25 = arith.constant 1.000000e+00 : f32
    %90 = vector.broadcast %cst_25 : f32 to vector<8x384xf32>
    %91 = arith.addf %90, %89 : vector<8x384xf32>
    %92 = arith.divf %90, %91 : vector<8x384xf32>
    %93 = vector.extract_strided_slice %86 {offsets = [0, 384], sizes = [8, 128], strides = [1, 1]} : vector<8x512xf32> to vector<8x128xf32>
    %94 = math.tanh %93 : vector<8x128xf32>
    %95 = vector.extract_strided_slice %92 {offsets = [0, 0], sizes = [8, 128], strides = [1, 1]} : vector<8x384xf32> to vector<8x128xf32>
    %96 = vector.extract_strided_slice %92 {offsets = [0, 128], sizes = [8, 128], strides = [1, 1]} : vector<8x384xf32> to vector<8x128xf32>
    %97 = vector.extract_strided_slice %92 {offsets = [0, 256], sizes = [8, 128], strides = [1, 1]} : vector<8x384xf32> to vector<8x128xf32>
    %98 = arith.mulf %96, %80 : vector<8x128xf32>
    %99 = arith.mulf %95, %94 : vector<8x128xf32>
    %100 = arith.addf %98, %99 : vector<8x128xf32>
    %101 = math.tanh %100 : vector<8x128xf32>
    %102 = arith.mulf %97, %101 : vector<8x128xf32>
    %103 = arith.addf %83, %102 : vector<8x128xf32>
    %c32 = arith.constant 32 : index
    %c0_26 = arith.constant 0 : index
    %104 = vector.load %arg7[%c32, %c0_26] : memref<64x512xf32, #tpu.memory_space<vmem>>, vector<8x512xf32>
    %cst_27 = arith.constant dense<0.000000e+00> : vector<8x512xf32>
    %105 = tpu.matmul %102, %7, %cst_27 {dimension_numbers = #tpu.dot_dimension_numbers<[1], [0], [0], [1], [0, 0, 1, 1], [], []>} : vector<8x128xf32>, vector<128x512xf32>, vector<8x512xf32> -> vector<8x512xf32>
    %106 = arith.addf %104, %105 : vector<8x512xf32>
    %107 = vector.extract_strided_slice %106 {offsets = [0, 0], sizes = [8, 384], strides = [1, 1]} : vector<8x512xf32> to vector<8x384xf32>
    %108 = arith.negf %107 : vector<8x384xf32>
    %109 = math.exp %108 : vector<8x384xf32>
    %cst_28 = arith.constant 1.000000e+00 : f32
    %110 = vector.broadcast %cst_28 : f32 to vector<8x384xf32>
    %111 = arith.addf %110, %109 : vector<8x384xf32>
    %112 = arith.divf %110, %111 : vector<8x384xf32>
    %113 = vector.extract_strided_slice %106 {offsets = [0, 384], sizes = [8, 128], strides = [1, 1]} : vector<8x512xf32> to vector<8x128xf32>
    %114 = math.tanh %113 : vector<8x128xf32>
    %115 = vector.extract_strided_slice %112 {offsets = [0, 0], sizes = [8, 128], strides = [1, 1]} : vector<8x384xf32> to vector<8x128xf32>
    %116 = vector.extract_strided_slice %112 {offsets = [0, 128], sizes = [8, 128], strides = [1, 1]} : vector<8x384xf32> to vector<8x128xf32>
    %117 = vector.extract_strided_slice %112 {offsets = [0, 256], sizes = [8, 128], strides = [1, 1]} : vector<8x384xf32> to vector<8x128xf32>
    %118 = arith.mulf %116, %100 : vector<8x128xf32>
    %119 = arith.mulf %115, %114 : vector<8x128xf32>
    %120 = arith.addf %118, %119 : vector<8x128xf32>
    %121 = math.tanh %120 : vector<8x128xf32>
    %122 = arith.mulf %117, %121 : vector<8x128xf32>
    %123 = arith.addf %103, %122 : vector<8x128xf32>
    %c40 = arith.constant 40 : index
    %c0_29 = arith.constant 0 : index
    %124 = vector.load %arg7[%c40, %c0_29] : memref<64x512xf32, #tpu.memory_space<vmem>>, vector<8x512xf32>
    %cst_30 = arith.constant dense<0.000000e+00> : vector<8x512xf32>
    %125 = tpu.matmul %122, %7, %cst_30 {dimension_numbers = #tpu.dot_dimension_numbers<[1], [0], [0], [1], [0, 0, 1, 1], [], []>} : vector<8x128xf32>, vector<128x512xf32>, vector<8x512xf32> -> vector<8x512xf32>
    %126 = arith.addf %124, %125 : vector<8x512xf32>
    %127 = vector.extract_strided_slice %126 {offsets = [0, 0], sizes = [8, 384], strides = [1, 1]} : vector<8x512xf32> to vector<8x384xf32>
    %128 = arith.negf %127 : vector<8x384xf32>
    %129 = math.exp %128 : vector<8x384xf32>
    %cst_31 = arith.constant 1.000000e+00 : f32
    %130 = vector.broadcast %cst_31 : f32 to vector<8x384xf32>
    %131 = arith.addf %130, %129 : vector<8x384xf32>
    %132 = arith.divf %130, %131 : vector<8x384xf32>
    %133 = vector.extract_strided_slice %126 {offsets = [0, 384], sizes = [8, 128], strides = [1, 1]} : vector<8x512xf32> to vector<8x128xf32>
    %134 = math.tanh %133 : vector<8x128xf32>
    %135 = vector.extract_strided_slice %132 {offsets = [0, 0], sizes = [8, 128], strides = [1, 1]} : vector<8x384xf32> to vector<8x128xf32>
    %136 = vector.extract_strided_slice %132 {offsets = [0, 128], sizes = [8, 128], strides = [1, 1]} : vector<8x384xf32> to vector<8x128xf32>
    %137 = vector.extract_strided_slice %132 {offsets = [0, 256], sizes = [8, 128], strides = [1, 1]} : vector<8x384xf32> to vector<8x128xf32>
    %138 = arith.mulf %136, %120 : vector<8x128xf32>
    %139 = arith.mulf %135, %134 : vector<8x128xf32>
    %140 = arith.addf %138, %139 : vector<8x128xf32>
    %141 = math.tanh %140 : vector<8x128xf32>
    %142 = arith.mulf %137, %141 : vector<8x128xf32>
    %143 = arith.addf %123, %142 : vector<8x128xf32>
    %c48 = arith.constant 48 : index
    %c0_32 = arith.constant 0 : index
    %144 = vector.load %arg7[%c48, %c0_32] : memref<64x512xf32, #tpu.memory_space<vmem>>, vector<8x512xf32>
    %cst_33 = arith.constant dense<0.000000e+00> : vector<8x512xf32>
    %145 = tpu.matmul %142, %7, %cst_33 {dimension_numbers = #tpu.dot_dimension_numbers<[1], [0], [0], [1], [0, 0, 1, 1], [], []>} : vector<8x128xf32>, vector<128x512xf32>, vector<8x512xf32> -> vector<8x512xf32>
    %146 = arith.addf %144, %145 : vector<8x512xf32>
    %147 = vector.extract_strided_slice %146 {offsets = [0, 0], sizes = [8, 384], strides = [1, 1]} : vector<8x512xf32> to vector<8x384xf32>
    %148 = arith.negf %147 : vector<8x384xf32>
    %149 = math.exp %148 : vector<8x384xf32>
    %cst_34 = arith.constant 1.000000e+00 : f32
    %150 = vector.broadcast %cst_34 : f32 to vector<8x384xf32>
    %151 = arith.addf %150, %149 : vector<8x384xf32>
    %152 = arith.divf %150, %151 : vector<8x384xf32>
    %153 = vector.extract_strided_slice %146 {offsets = [0, 384], sizes = [8, 128], strides = [1, 1]} : vector<8x512xf32> to vector<8x128xf32>
    %154 = math.tanh %153 : vector<8x128xf32>
    %155 = vector.extract_strided_slice %152 {offsets = [0, 0], sizes = [8, 128], strides = [1, 1]} : vector<8x384xf32> to vector<8x128xf32>
    %156 = vector.extract_strided_slice %152 {offsets = [0, 128], sizes = [8, 128], strides = [1, 1]} : vector<8x384xf32> to vector<8x128xf32>
    %157 = vector.extract_strided_slice %152 {offsets = [0, 256], sizes = [8, 128], strides = [1, 1]} : vector<8x384xf32> to vector<8x128xf32>
    %158 = arith.mulf %156, %140 : vector<8x128xf32>
    %159 = arith.mulf %155, %154 : vector<8x128xf32>
    %160 = arith.addf %158, %159 : vector<8x128xf32>
    %161 = math.tanh %160 : vector<8x128xf32>
    %162 = arith.mulf %157, %161 : vector<8x128xf32>
    %163 = arith.addf %143, %162 : vector<8x128xf32>
    %c56 = arith.constant 56 : index
    %c0_35 = arith.constant 0 : index
    %164 = vector.load %arg7[%c56, %c0_35] : memref<64x512xf32, #tpu.memory_space<vmem>>, vector<8x512xf32>
    %cst_36 = arith.constant dense<0.000000e+00> : vector<8x512xf32>
    %165 = tpu.matmul %162, %7, %cst_36 {dimension_numbers = #tpu.dot_dimension_numbers<[1], [0], [0], [1], [0, 0, 1, 1], [], []>} : vector<8x128xf32>, vector<128x512xf32>, vector<8x512xf32> -> vector<8x512xf32>
    %166 = arith.addf %164, %165 : vector<8x512xf32>
    %167 = vector.extract_strided_slice %166 {offsets = [0, 0], sizes = [8, 384], strides = [1, 1]} : vector<8x512xf32> to vector<8x384xf32>
    %168 = arith.negf %167 : vector<8x384xf32>
    %169 = math.exp %168 : vector<8x384xf32>
    %cst_37 = arith.constant 1.000000e+00 : f32
    %170 = vector.broadcast %cst_37 : f32 to vector<8x384xf32>
    %171 = arith.addf %170, %169 : vector<8x384xf32>
    %172 = arith.divf %170, %171 : vector<8x384xf32>
    %173 = vector.extract_strided_slice %166 {offsets = [0, 384], sizes = [8, 128], strides = [1, 1]} : vector<8x512xf32> to vector<8x128xf32>
    %174 = math.tanh %173 : vector<8x128xf32>
    %175 = vector.extract_strided_slice %172 {offsets = [0, 0], sizes = [8, 128], strides = [1, 1]} : vector<8x384xf32> to vector<8x128xf32>
    %176 = vector.extract_strided_slice %172 {offsets = [0, 128], sizes = [8, 128], strides = [1, 1]} : vector<8x384xf32> to vector<8x128xf32>
    %177 = vector.extract_strided_slice %172 {offsets = [0, 256], sizes = [8, 128], strides = [1, 1]} : vector<8x384xf32> to vector<8x128xf32>
    %178 = arith.mulf %176, %160 : vector<8x128xf32>
    %179 = arith.mulf %175, %174 : vector<8x128xf32>
    %180 = arith.addf %178, %179 : vector<8x128xf32>
    %181 = math.tanh %180 : vector<8x128xf32>
    %182 = arith.mulf %177, %181 : vector<8x128xf32>
    %183 = arith.mulf %182, %22 : vector<8x128xf32>
    %184 = arith.addf %163, %183 : vector<8x128xf32>
    %cst_38 = arith.constant 0.142857149 : f32
    %185 = vector.broadcast %cst_38 : f32 to vector<8x128xf32>
    %186 = arith.mulf %184, %185 : vector<8x128xf32>
    %c0_39 = arith.constant 0 : index
    %c0_40 = arith.constant 0 : index
    %187 = vector.load %arg4[%c0_39, %c0_40] : memref<128x32xf32, #tpu.memory_space<vmem>>, vector<128x32xf32>
    %cst_41 = arith.constant dense<0.000000e+00> : vector<8x32xf32>
    %188 = tpu.matmul %186, %187, %cst_41 {dimension_numbers = #tpu.dot_dimension_numbers<[1], [0], [0], [1], [0, 0, 1, 1], [], []>} : vector<8x128xf32>, vector<128x32xf32>, vector<8x32xf32> -> vector<8x32xf32>
    %c0_42 = arith.constant 0 : index
    %c0_43 = arith.constant 0 : index
    %189 = vector.load %arg5[%c0_42, %c0_43] : memref<1x32xf32, #tpu.memory_space<vmem>>, vector<1x32xf32>
    %190 = vector.broadcast %189 : vector<1x32xf32> to vector<8x32xf32>
    %191 = arith.addf %188, %190 : vector<8x32xf32>
    %c0_44 = arith.constant 0 : index
    %c0_45 = arith.constant 0 : index
    %192 = vector.load %arg6[%c0_44, %c0_45] : memref<8x32xf32, #tpu.memory_space<vmem>>, vector<8x32xf32>
    tpu.vector_store %arg6[%c0_44, %c0_45], %191 {strides = array<i32>} : memref<8x32xf32, #tpu.memory_space<vmem>>, vector<8x32xf32>,
    return
  }
}

</mosaic_0001>

<bundles_post_ra>
// kernel: tpu_custom_call.1
= control target key start
LH: loop header
LB: loop body
LE: loop exit
PB: predicated region body
PF: predicated region fallthrough
CT: control target
= control target key end

     0   :  { %11 = vsyncpa [#allocation4], 0  ;;  %s3471_s0 = inlined_call_operand.vmem [shape: f32[64,16], index: 0, kind: input, shape index: {}]   ;;  %s3472_s1 = inlined_call_operand.vmem [shape: f32[16,512], index: 1, kind: input, shape index: {}]   ;;  %s3473_s2 = inlined_call_operand.hbm [shape: f32[128,512], index: 2, kind: input, shape index: {}]   ;;  %s3474_s3 = inlined_call_operand.vmem [shape: f32[1,512], index: 3, kind: input, shape index: {}]   ;;  %s3475_s4 = inlined_call_operand.vmem [shape: f32[128,32], index: 4, kind: input, shape index: {}]   ;;  %s3476_s5 = inlined_call_operand.vmem [shape: f32[1,32], index: 5, kind: input, shape index: {}]   ;;  %s3477_s6 = inlined_call_operand.hbm [shape: f32[8,32], index: 6, kind: output, shape index: {}]  }
   0x1   :  { %12 = vsyncpa [#allocation5], 0  ;;  %s2832_s21 = smov [#allocation3]   ;;  %s2784_s25 = scalar_lea.hbm %s3473_s2, 8192 }
   0x2   :  { %s22_s22 = sshll.u32 %s2832_s21, 4  ;;  %p2785_p0 = scmp.ne.s32.totalorder %s3473_s2, %s2784_s25  ;;  %s23_s22 = int_to_ptr.vmem [resolvable:$true] %s22_s22 }
   0x3   :  { %p2788_p1 = scmp.lt.u32.totalorder %s2784_s25, %s3473_s2 }
   0x5   :  { %p2790_p2 = pnand %p2788_p1, %p2785_p0 }
   0x7   :  { %2793 = shalt.err (!%p2790_p2)
}
   0x8   :  { %s2794_s30 = scalar_lea.vmem %s23_s22, 8192  ;;  %p2799_p4 = scmp.lt.s32.totalorder %s23_s22, %s23_s22 }
   0x9   :  { %p2795_p3 = scmp.ne.s32.totalorder %s23_s22, %s2794_s30  ;;  %p2800_p5 = scmp.lt.s32.totalorder %s2794_s30, %s2794_s30 }
   0xb   :  { %p2801_p6 = por %p2800_p5, %p2799_p4 }
   0xd   :  { %p2802_p7 = pnand %p2801_p6, %p2795_p3 }
   0xf   :  { %2805 = shalt.err (!%p2802_p7)
}
  0x10   :  { %s2833_s7 = smov 512   ;;  %s2834_s8 = smov 32  }
  0x11   :  { %28 = dma.hbm_to_vmem [thread:$0]  %s3473_s2, 8192, %s23_s22, [#allocation4], %s2833_s7, %s2833_s7, %s2834_s8  }
  0x12   :  { %2828 = dma.done.wait [#allocation4], 8192  }
  0x13   :  { %2829 = vsyncadd [#allocation4], 4294959104  ;;  %v2835_v0 = vmov 0.0   ;;  %v47_v1 = vld [vmem:[%s3472_s1 + $0x8] sm:$0xff]  ;;  %v49_v3 = vld [vmem:[%s3472_s1 + $0x18] sm:$0xff]  ;;  %vm76_vm0 = vcmask 130048  }
  0x14   :  { %165 = vmatprep.mubr.f32.mxu0 %v2835_v0  ;;  %278 = vmatprep.mubr.f32.mxu1 %v2835_v0  ;;  %v51_v2 = vld [vmem:[%s3472_s1 + $0x28] sm:$0xff]  ;;  %v53_v5 = vld [vmem:[%s3472_s1 + $0x38] sm:$0xff]  ;;  %v46_v6 = vld [vmem:[%s3472_s1] sm:$0xff]  ;;  %vm2837_vm2 = vmmov 0   ;;  %s2838_s21 = smov [#allocation6]   ;;  %vm1929_vm6 = vcmask 261120  }
  0x15   :  { %v2041_v4 = vpack.c.bf16 %v51_v2, %v47_v1  ;;  %v50_v7 = vld [vmem:[%s3472_s1 + $0x20] sm:$0xff]  ;;  %v2045_v8 = vpack.c.bf16 %v53_v5, %v49_v3  ;;  %v48_v10 = vld [vmem:[%s3472_s1 + $0x10] sm:$0xff]  ;;  %v360_v14 = vld [vmem:[#allocation3 + $0x8] sm:$0xff]  ;;  %s1937_s22 = sshll.u32 %s2838_s21, 4  ;;  %s1938_s22 = int_to_ptr.vmem [resolvable:$true] %s1937_s22 }
  0x16   :  { %v2043_v9 = vpack.c.bf16 %v50_v7, %v46_v6  ;;  %v52_v11 = vld [vmem:[%s3472_s1 + $0x30] sm:$0xff]  ;;  %v38_v12 = vld [vmem:[%s3471_s0] sm:$0xff]  ;;  %v364_v15 = vld [vmem:[#allocation3 + $0x28] sm:$0xff]  ;;  %s2806_s23 = scalar_lea.vmem %s1938_s22, 128  ;;  %p2811_p9 = scmp.lt.s32.totalorder %s1938_s22, %s1938_s22 }
  0x17   :  { %2042 = vmatprep.subr.bf16.mxu0 %v2041_v4  ;;  %v2047_v13 = vpack.c.bf16 %v52_v11, %v48_v10  ;;  %v362_v16 = vld [vmem:[#allocation3 + $0x18] sm:$0xff]  ;;  %2046 = vmatprep.subr.bf16.mxu1 %v2045_v8  ;;  %v2915_v17 = vpack.c.bf16 %v364_v15, %v360_v14  ;;  %v359_v19 = vld [vmem:[#allocation3] sm:$0xff]  ;;  %v361_v23 = vld [vmem:[#allocation3 + $0x10] sm:$0xff]  ;;  %p2807_p8 = scmp.ne.s32.totalorder %s1938_s22, %s2806_s23  ;;  %p2812_p10 = scmp.lt.s32.totalorder %s2806_s23, %s2806_s23 }
  0x18   :  { %2044 = vmatpush1.bf16.msra.mxu0 %v2043_v9  ;;  %v366_v18 = vld [vmem:[#allocation3 + $0x38] sm:$0xff]  ;;  %v363_v20 = vld [vmem:[#allocation3 + $0x20] sm:$0xff]  ;;  %v365_v24 = vld [vmem:[#allocation3 + $0x30] sm:$0xff] }
  0x19   :  { %2048 = vmatpush1.bf16.msra.mxu1 %v2047_v13  ;;  %v2917_v21 = vpack.c.bf16 %v366_v18, %v362_v16  ;;  %v2919_v22 = vpack.c.bf16 %v363_v20, %v359_v19  ;;  %2050 = vmatprep.subr.bf16.mxu0 %v2915_v17  ;;  %v2922_v25 = vpack.c.bf16 %v365_v24, %v361_v23  ;;  %v368_v26 = vld [vmem:[#allocation3 + $0x48] sm:$0xff]  ;;  %v370_v28 = vld [vmem:[#allocation3 + $0x58] sm:$0xff]  ;;  %v367_v31 = vld [vmem:[#allocation3 + $0x40] sm:$0xff]  ;;  %p2813_p11 = por %p2812_p10, %p2811_p9 }
  0x1a   :  { %v372_v27 = vld [vmem:[#allocation3 + $0x68] sm:$0xff]  ;;  %v374_v30 = vld [vmem:[#allocation3 + $0x78] sm:$0xff]  ;;  %v371_v32 = vld [vmem:[#allocation3 + $0x60] sm:$0xff] }
  0x1b   :  { %1946 = vmatmul.mubr.msk.f32.vlgmr.msra.gmra.mrb[0].mxu0 %vm76_vm0, %v38_v12  ;;  %2082 = vmatprep.subr.bf16.mxu1 %v2917_v21  ;;  %v2926_v29 = vpack.c.bf16 %v372_v27, %v368_v26  ;;  %v39_v33 = vld [vmem:[%s3471_s0 + $0x8] sm:$0xff]  ;;  %v2933_v34 = vpack.c.bf16 %v374_v30, %v370_v28  ;;  %v2935_v35 = vpack.c.bf16 %v371_v32, %v367_v31  ;;  %v369_v36 = vld [vmem:[#allocation3 + $0x50] sm:$0xff]  ;;  %v378_v41 = vld [vmem:[#allocation3 + $0x98] sm:$0xff]  ;;  %p2814_p12 = pnand %p2813_p11, %p2807_p8 }
  0x1c   :  { %1954 = vmatmul.mubr.msk.f32.vlgmr.msra.gmra.mrb[0].mxu1 %vm76_vm0, %v38_v12  ;;  %2052 = vmatpush1.bf16.msra.mxu0 %v2919_v22  ;;  %v373_v37 = vld [vmem:[#allocation3 + $0x70] sm:$0xff]  ;;  %v376_v39 = vld [vmem:[#allocation3 + $0x88] sm:$0xff]  ;;  %v382_v43 = vld [vmem:[#allocation3 + $0xb8] sm:$0xff] }
  0x1d   :  { %2084 = vmatpush1.bf16.msra.mxu1 %v2922_v25  ;;  %171 = vmatprep.mubr.f32.mxu0 %v2835_v0  ;;  %v2939_v38 = vpack.c.bf16 %v373_v37, %v369_v36  ;;  %v380_v40 = vld [vmem:[#allocation3 + $0xa8] sm:$0xff]  ;;  %v375_v44 = vld [vmem:[#allocation3 + $0x80] sm:$0xff]  ;;  %v40_v46 = vld [vmem:[%s3471_s0 + $0x10] sm:$0xff]  ;;  %v2950_v47 = vpack.c.bf16 %v382_v43, %v378_v41 }
  0x1e   :  { %284 = vmatprep.mubr.f32.mxu1 %v2835_v0  ;;  %2054 = vmatprep.subr.bf16.mxu0 %v2926_v29  ;;  %v2943_v42 = vpack.c.bf16 %v380_v40, %v376_v39  ;;  %v379_v45 = vld [vmem:[#allocation3 + $0xa0] sm:$0xff]  ;;  %v377_v48 = vld [vmem:[#allocation3 + $0x90] sm:$0xff]  ;;  %v384_v51 = vld [vmem:[#allocation3 + $0xc8] sm:$0xff] }
  0x1f   :  { %1947 = vmatmul.mubr.msk.f32.gmra.mrb[2].mxu0 %vm76_vm0, %v39_v33  ;;  %2086 = vmatprep.subr.bf16.mxu1 %v2933_v34  ;;  %v381_v49 = vld [vmem:[#allocation3 + $0xb0] sm:$0xff]  ;;  %v2954_v50 = vpack.c.bf16 %v379_v45, %v375_v44  ;;  %v388_v52 = vld [vmem:[#allocation3 + $0xe8] sm:$0xff]  ;;  %v386_v53 = vld [vmem:[#allocation3 + $0xd8] sm:$0xff] }
  0x20   :  { %1955 = vmatmul.mubr.msk.f32.gmra.mrb[2].mxu1 %vm76_vm0, %v39_v33  ;;  %2056 = vmatpush1.bf16.msra.mxu0 %v2935_v35  ;;  %v2958_v54 = vpack.c.bf16 %v381_v49, %v377_v48  ;;  %v390_v55 = vld [vmem:[#allocation3 + $0xf8] sm:$0xff]  ;;  %v383_v56 = vld [vmem:[#allocation3 + $0xc0] sm:$0xff]  ;;  %v2962_v58 = vpack.c.bf16 %v388_v52, %v384_v51  ;;  %v385_v59 = vld [vmem:[#allocation3 + $0xd0] sm:$0xff] }
  0x21   :  { %2088 = vmatpush1.bf16.msra.mxu1 %v2939_v38  ;;  %177 = vmatprep.mubr.f32.mxu0 %v2835_v0  ;;  %v387_v57 = vld [vmem:[#allocation3 + $0xe0] sm:$0xff]  ;;  %v389_v60 = vld [vmem:[#allocation3 + $0xf0] sm:$0xff]  ;;  %v2966_v61 = vpack.c.bf16 %v390_v55, %v386_v53  ;;  %v392_v62 = vld [vmem:[#allocation3 + $0x108] sm:$0xff] }
  0x22   :  { %290 = vmatprep.mubr.f32.mxu1 %v2835_v0  ;;  %2058 = vmatprep.subr.bf16.mxu0 %v2943_v42  ;;  %v396_v63 = vld [vmem:[#allocation3 + $0x128] sm:$0xff]  ;;  %v41_v1 = vld [vmem:[%s3471_s0 + $0x18] sm:$0xff]  ;;  %v2973_v2 = vpack.c.bf16 %v387_v57, %v383_v56  ;;  %v2977_v5 = vpack.c.bf16 %v389_v60, %v385_v59  ;;  %v391_v6 = vld [vmem:[#allocation3 + $0x100] sm:$0xff] }
  0x23   :  { %1948 = vmatmul.mubr.msk.f32.gmra.mrb[4].mxu0 %vm76_vm0, %v40_v46  ;;  %2090 = vmatprep.subr.bf16.mxu1 %v2950_v47  ;;  %v394_v3 = vld [vmem:[#allocation3 + $0x118] sm:$0xff]  ;;  %v395_v7 = vld [vmem:[#allocation3 + $0x120] sm:$0xff]  ;;  %v2981_v8 = vpack.c.bf16 %v396_v63, %v392_v62  ;;  %v393_v9 = vld [vmem:[#allocation3 + $0x110] sm:$0xff] }
  0x24   :  { %1956 = vmatmul.mubr.msk.f32.gmra.mrb[4].mxu1 %vm76_vm0, %v40_v46  ;;  %2060 = vmatpush1.bf16.msra.mxu0 %v2954_v50  ;;  %v398_v4 = vld [vmem:[#allocation3 + $0x138] sm:$0xff]  ;;  %v397_v10 = vld [vmem:[#allocation3 + $0x130] sm:$0xff]  ;;  %v400_v12 = vld [vmem:[#allocation3 + $0x148] sm:$0xff]  ;;  %v2992_v15 = vpack.c.bf16 %v395_v7, %v391_v6  ;;  %v56_v7 = vlaneseq }
  0x25   :  { %2092 = vmatpush1.bf16.msra.mxu1 %v2958_v54  ;;  %183 = vmatprep.mubr.f32.mxu0 %v2835_v0  ;;  %v2985_v11 = vpack.c.bf16 %v398_v4, %v394_v3  ;;  %v404_v13 = vld [vmem:[#allocation3 + $0x168] sm:$0xff]  ;;  %v42_v14 = vld [vmem:[%s3471_s0 + $0x20] sm:$0xff]  ;;  %v402_v16 = vld [vmem:[#allocation3 + $0x158] sm:$0xff]  ;;  %v2996_v19 = vpack.c.bf16 %v397_v10, %v393_v9 }
  0x26   :  { %296 = vmatprep.mubr.f32.mxu1 %v2835_v0  ;;  %2062 = vmatprep.subr.bf16.mxu0 %v2962_v58  ;;  %v406_v18 = vld [vmem:[#allocation3 + $0x178] sm:$0xff]  ;;  %v399_v20 = vld [vmem:[#allocation3 + $0x140] sm:$0xff]  ;;  %v3000_v24 = vpack.c.bf16 %v404_v13, %v400_v12  ;;  %v401_v26 = vld [vmem:[#allocation3 + $0x150] sm:$0xff]  ;;  %v57_v9 = vshrl.u32 %v56_v7, 7 }
  0x27   :  { %1949 = vmatmul.mubr.msk.f32.gmra.mrb[6].mxu0 %vm76_vm0, %v41_v1  ;;  %2094 = vmatprep.subr.bf16.mxu1 %v2966_v61  ;;  %v403_v23 = vld [vmem:[#allocation3 + $0x160] sm:$0xff]  ;;  %v405_v27 = vld [vmem:[#allocation3 + $0x170] sm:$0xff]  ;;  %v3004_v28 = vpack.c.bf16 %v406_v18, %v402_v16  ;;  %v408_v30 = vld [vmem:[#allocation3 + $0x188] sm:$0xff] }
  0x28   :  { %1957 = vmatmul.mubr.msk.f32.gmra.mrb[6].mxu1 %vm76_vm0, %v41_v1  ;;  %2064 = vmatpush1.bf16.msra.mxu0 %v2973_v2  ;;  %v412_v31 = vld [vmem:[#allocation3 + $0x1a8] sm:$0xff]  ;;  %v3011_v33 = vpack.c.bf16 %v403_v23, %v399_v20  ;;  %v410_v36 = vld [vmem:[#allocation3 + $0x198] sm:$0xff]  ;;  %v3015_v39 = vpack.c.bf16 %v405_v27, %v401_v26  ;;  %v407_v40 = vld [vmem:[#allocation3 + $0x180] sm:$0xff]  ;;  %v58_v10 = vsub.s32 0, %v57_v9  ;;  %v62_v13 = vsub.s32 1, %v57_v9 }
  0x29   :  { %2096 = vmatpush1.bf16.msra.mxu1 %v2977_v5  ;;  %189 = vmatprep.mubr.f32.mxu0 %v2835_v0  ;;  %v43_v32 = vld [vmem:[%s3471_s0 + $0x28] sm:$0xff]  ;;  %v414_v37 = vld [vmem:[#allocation3 + $0x1b8] sm:$0xff]  ;;  %v411_v41 = vld [vmem:[#allocation3 + $0x1a0] sm:$0xff]  ;;  %v3019_v43 = vpack.c.bf16 %v412_v31, %v408_v30  ;;  %v66_v20 = vsub.s32 2, %v57_v9 }
  0x2a   :  { %302 = vmatprep.mubr.f32.mxu1 %v2835_v0  ;;  %2066 = vmatprep.subr.bf16.mxu0 %v2981_v8  ;;  %v409_v44 = vld [vmem:[#allocation3 + $0x190] sm:$0xff]  ;;  %v3023_v46 = vpack.c.bf16 %v414_v37, %v410_v36  ;;  %v416_v48 = vld [vmem:[#allocation3 + $0x1c8] sm:$0xff]  ;;  %v3030_v52 = vpack.c.bf16 %v411_v41, %v407_v40  ;;  %v418_v53 = vld [vmem:[#allocation3 + $0x1d8] sm:$0xff]  ;;  %v70_v40 = vsub.s32 3, %v57_v9 }
  0x2b   :  { %1950 = vmatmul.mubr.msk.f32.gmra.mrb[8].mxu0 %vm76_vm0, %v42_v14  ;;  %2098 = vmatprep.subr.bf16.mxu1 %v2985_v11  ;;  %v413_v45 = vld [vmem:[#allocation3 + $0x1b0] sm:$0xff]  ;;  %v420_v49 = vld [vmem:[#allocation3 + $0x1e8] sm:$0xff]  ;;  %v422_v55 = vld [vmem:[#allocation3 + $0x1f8] sm:$0xff] }
  0x2c   :  { %1958 = vmatmul.mubr.msk.f32.gmra.mrb[8].mxu1 %vm76_vm0, %v42_v14  ;;  %2068 = vmatpush1.bf16.msra.mxu0 %v2992_v15  ;;  %v44_v51 = vld [vmem:[%s3471_s0 + $0x30] sm:$0xff]  ;;  %v3034_v56 = vpack.c.bf16 %v413_v45, %v409_v44  ;;  %v415_v57 = vld [vmem:[#allocation3 + $0x1c0] sm:$0xff]  ;;  %v3038_v60 = vpack.c.bf16 %v420_v49, %v416_v48  ;;  %v3042_v1 = vpack.c.bf16 %v422_v55, %v418_v53  ;;  %v45_v3 = vld [vmem:[%s3471_s0 + $0x38] sm:$0xff] }
  0x2d   :  { %2100 = vmatpush1.bf16.msra.mxu1 %v2996_v19  ;;  %195 = vmatprep.mubr.f32.mxu0 %v2835_v0  ;;  %v419_v59 = vld [vmem:[#allocation3 + $0x1e0] sm:$0xff]  ;;  %v417_v62 = vld [vmem:[#allocation3 + $0x1d0] sm:$0xff] }
  0x2e   :  { %308 = vmatprep.mubr.f32.mxu1 %v2835_v0  ;;  %2070 = vmatprep.subr.bf16.mxu0 %v3000_v24  ;;  %v421_v63 = vld [vmem:[#allocation3 + $0x1f0] sm:$0xff]  ;;  %v3049_v4 = vpack.c.bf16 %v419_v59, %v415_v57  ;;  %v54_v12 = vld [vmem:[%s3474_s3] sm:$0xf] }
  0x2f   :  { %1951 = vmatmul.mubr.msk.f32.gmra.mrb[10].mxu0 %vm76_vm0, %v43_v32  ;;  %2102 = vmatprep.subr.bf16.mxu1 %v3004_v28  ;;  %v3053_v6 = vpack.c.bf16 %v421_v63, %v417_v62  ;;  %v3106_v14 = vrot.slane %v54_v12, %v58_v10  ;;  %v3108_v16 = vrot.slane %v54_v12, %v62_v13 }
  0x30   :  { %1959 = vmatmul.mubr.msk.f32.gmra.mrb[10].mxu1 %vm76_vm0, %v43_v32  ;;  %2072 = vmatpush1.bf16.msra.mxu0 %v3011_v33  ;;  %v3112_v36 = vrot.slane %v54_v12, %v66_v20  ;;  %v3115_v44 = vrot.slane %v54_v12, %v70_v40 }
  0x31   :  { %2104 = vmatpush1.bf16.msra.mxu1 %v3015_v39  ;;  %201 = vmatprep.mubr.f32.mxu0 %v2835_v0 }
  0x32   :  { %314 = vmatprep.mubr.f32.mxu1 %v2835_v0  ;;  %2074 = vmatprep.subr.bf16.mxu0 %v3019_v43 }
  0x33   :  { %1952 = vmatmul.mubr.msk.f32.gmra.mrb[12].mxu0 %vm76_vm0, %v44_v51  ;;  %2106 = vmatprep.subr.bf16.mxu1 %v3023_v46 }
  0x34   :  { %1960 = vmatmul.mubr.msk.f32.gmra.mrb[12].mxu1 %vm76_vm0, %v44_v51  ;;  %2076 = vmatpush1.bf16.msra.mxu0 %v3030_v52 }
  0x35   :  { %2108 = vmatpush1.bf16.msra.mxu1 %v3034_v56  ;;  %207 = vmatprep.mubr.f32.mxu0 %v2835_v0 }
  0x36   :  { %320 = vmatprep.mubr.f32.mxu1 %v2835_v0  ;;  %2078 = vmatprep.subr.bf16.mxu0 %v3038_v60 }
  0x37   :  { %1953 = vmatmul.mubr.msk.f32.gmra.mrb[14].mxu0 %vm76_vm0, %v45_v3  ;;  %2110 = vmatprep.subr.bf16.mxu1 %v3042_v1 }
  0x38   :  { %1961 = vmatmul.mubr.msk.f32.gmra.mrb[14].mxu1 %vm76_vm0, %v45_v3  ;;  %2080 = vmatpush1.bf16.msra.mxu0 %v3049_v4 }
  0x39   :  { %2112 = vmatpush1.bf16.msra.mxu1 %v3053_v6  ;;  %501 = vmatprep.mubr.f32.mxu0 %v2835_v0 }
  0x3a   :  { %572 = vmatprep.mubr.f32.mxu1 %v2835_v0  ;;  %2114 = vmatprep.subr.bf16.mxu0 %v2915_v17 }
  0x3b   :  { %502 = vmatmul.mubr.f32.vlgmr.msra.gmra.mrb[0].mxu0 %v2835_v0  ;;  %2146 = vmatprep.subr.bf16.mxu1 %v2917_v21 }
  0x3c   :  { %573 = vmatmul.mubr.f32.vlgmr.msra.gmra.mrb[0].mxu1 %v2835_v0  ;;  %2116 = vmatpush1.bf16.msra.mxu0 %v2919_v22 }
  0x3d   :  { %2148 = vmatpush1.bf16.msra.mxu1 %v2922_v25  ;;  %2118 = vmatprep.subr.bf16.mxu0 %v2926_v29 }
  0x3e   :  { %2150 = vmatprep.subr.bf16.mxu1 %v2933_v34  ;;  %677 = vmatprep.mubr.f32.mxu0 %v2835_v0 }
  0x3f   :  { %748 = vmatprep.mubr.f32.mxu1 %v2835_v0 }
  0x40   :  { %2120 = vmatpush1.bf16.msra.mxu0 %v2935_v35 }
  0x41   :  { %2152 = vmatpush1.bf16.msra.mxu1 %v2939_v38  ;;  %2122 = vmatprep.subr.bf16.mxu0 %v2943_v42 }
  0x42   :  { %2154 = vmatprep.subr.bf16.mxu1 %v2950_v47 }
  0x44   :  { %2124 = vmatpush1.bf16.msra.mxu0 %v2954_v50 }
  0x45   :  { %2156 = vmatpush1.bf16.msra.mxu1 %v2958_v54  ;;  %2126 = vmatprep.subr.bf16.mxu0 %v2962_v58 }
  0x46   :  { %2158 = vmatprep.subr.bf16.mxu1 %v2966_v61 }
  0x48   :  { %2128 = vmatpush1.bf16.msra.mxu0 %v2973_v2 }
  0x49   :  { %2160 = vmatpush1.bf16.msra.mxu1 %v2977_v5  ;;  %2130 = vmatprep.subr.bf16.mxu0 %v2981_v8 }
  0x4a   :  { %2162 = vmatprep.subr.bf16.mxu1 %v2985_v11 }
  0x4c   :  { %2132 = vmatpush1.bf16.msra.mxu0 %v2992_v15 }
  0x4d   :  { %2164 = vmatpush1.bf16.msra.mxu1 %v2996_v19  ;;  %2134 = vmatprep.subr.bf16.mxu0 %v3000_v24 }
  0x4e   :  { %2166 = vmatprep.subr.bf16.mxu1 %v3004_v28 }
  0x50   :  { %2136 = vmatpush1.bf16.msra.mxu0 %v3011_v33 }
  0x51   :  { %2168 = vmatpush1.bf16.msra.mxu1 %v3015_v39  ;;  %2138 = vmatprep.subr.bf16.mxu0 %v3019_v43 }
  0x52   :  { %2170 = vmatprep.subr.bf16.mxu1 %v3023_v46 }
  0x54   :  { %2140 = vmatpush1.bf16.msra.mxu0 %v3030_v52 }
  0x55   :  { %2172 = vmatpush1.bf16.msra.mxu1 %v3034_v56  ;;  %2142 = vmatprep.subr.bf16.mxu0 %v3038_v60 }
  0x56   :  { %2174 = vmatprep.subr.bf16.mxu1 %v3042_v1 }
  0x58   :  { %2144 = vmatpush1.bf16.msra.mxu0 %v3049_v4 }
  0x59   :  { %2176 = vmatpush1.bf16.msra.mxu1 %v3053_v6  ;;  %2178 = vmatprep.subr.bf16.mxu0 %v2915_v17 }
  0x5a   :  { %2210 = vmatprep.subr.bf16.mxu1 %v2917_v21 }
 0x10e   :  { %v503_v18 = vpop.f32.mrb[0].mxu0 }
 0x10f   :  { %v2585_v23 = vadd.f32 %v503_v18, %v3106_v14  ;;  %v574_v26 = vpop.f32.mrb[0].mxu1  ;;  %v505_v27 = vpop.f32.mrb[1].mxu0 }
 0x110   :  { %v2586_v30 = vadd.f32 %v505_v27, %v3108_v16  ;;  %v576_v31 = vpop.f32.mrb[1].mxu1  ;;  %v2601_v41 = vadd.f32 %v574_v26, %v3112_v36 }
 0x111   :  { %v1964_v32 = vmul.f32 -1.442695, %v2585_v23  ;;  %v2602_v48 = vadd.f32 %v576_v31, %v3115_v44 }
 0x112   :  { %v1965_v37 = vmul.f32 -1.442695, %v2586_v30  ;;  %v1966_v45 = vmul.f32 -1.442695, %v2601_v41 }
 0x113   :  { %2656 = vpow2.f32 %v1964_v32 }
 0x114   :  { %2658 = vpow2.f32 %v1965_v37 }
 0x115   :  { %2660 = vpow2.f32 %v1966_v45 }
 0x116   :  { %2662 = vtanh.f32 %v2602_v48 }
 0x11d   :  { %v2657_v49 = vpop.eup %2656 }
 0x11e   :  { %v592_v51 = vadd.f32 1.0, %v2657_v49  ;;  %v2659_v53 = vpop.eup %2658 }
 0x11f   :  { %v593_v55 = vadd.f32 1.0, %v2659_v53  ;;  %v2661_v57 = vpop.eup %2660 }
 0x120   :  { %2664 = vrcp.f32 %v592_v51  ;;  %v2663_v59 = vpop.eup %2662  ;;  %v594_v9 = vadd.f32 1.0, %v2661_v57 }
 0x121   :  { %2666 = vrcp.f32 %v593_v55 }
 0x122   :  { %2668 = vrcp.f32 %v594_v9 }
 0x12a   :  { %v2665_v62 = vpop.eup %2664 }
 0x12b   :  { %v603_v63 = vmul.f32 %v2665_v62, %v2663_v59  ;;  %v2667_v3 = vpop.eup %2666 }
 0x12c   :  { %v602_v10 = vmul.f32 0.0, %v2667_v3  ;;  %v2669_v13 = vpop.eup %2668 }
 0x12e   :  { %v3118_v12 = vadd.f32 %v603_v63, %v602_v10 }
 0x130   :  { %2670 = vtanh.f32 %v3118_v12 }
 0x13a   :  { %v2671_v18 = vpop.eup %2670 }
 0x13b   :  { %v3121_v20 = vmul.f32 %v2671_v18, %v2669_v13  ;;  %v3168_v18 = vand.u32 127, %v56_v7 }
 0x13d   :  { %678 = vmatmul.mubr.f32.vlgmr.msra.gmra.mrb[2].mxu0 %v3121_v20  ;;  %749 = vmatmul.mubr.f32.vlgmr.msra.gmra.mrb[2].mxu1 %v3121_v20  ;;  %vm425_vm1 = vcmp.lt.s32.totalorder %v3168_v18, 32  ;;  %vm428_vm3 = vcmp.ge.s32.totalorder %v3168_v18, 32  ;;  %vm429_vm4 = vcmp.lt.s32.totalorder %v3168_v18, 64 }
 0x13e   :  { %2180 = vmatpush1.bf16.msra.mxu0 %v2919_v22  ;;  %2212 = vmatpush1.bf16.msra.mxu1 %v2922_v25  ;;  %vm430_vm5 = vmand %vm428_vm3, %vm429_vm4 }
 0x13f   :  { %2182 = vmatprep.subr.bf16.mxu0 %v2926_v29  ;;  %2214 = vmatprep.subr.bf16.mxu1 %v2933_v34 }
 0x140   :  { %852 = vmatprep.mubr.f32.mxu0 %v2835_v0  ;;  %923 = vmatprep.mubr.f32.mxu1 %v2835_v0 }
 0x142   :  { %2184 = vmatpush1.bf16.msra.mxu0 %v2935_v35  ;;  %2216 = vmatpush1.bf16.msra.mxu1 %v2939_v38 }
 0x143   :  { %2186 = vmatprep.subr.bf16.mxu0 %v2943_v42  ;;  %2218 = vmatprep.subr.bf16.mxu1 %v2950_v47 }
 0x146   :  { %2188 = vmatpush1.bf16.msra.mxu0 %v2954_v50  ;;  %2220 = vmatpush1.bf16.msra.mxu1 %v2958_v54 }
 0x147   :  { %2190 = vmatprep.subr.bf16.mxu0 %v2962_v58  ;;  %2222 = vmatprep.subr.bf16.mxu1 %v2966_v61 }
 0x14a   :  { %2192 = vmatpush1.bf16.msra.mxu0 %v2973_v2  ;;  %2224 = vmatpush1.bf16.msra.mxu1 %v2977_v5 }
 0x14b   :  { %2194 = vmatprep.subr.bf16.mxu0 %v2981_v8  ;;  %2226 = vmatprep.subr.bf16.mxu1 %v2985_v11 }
 0x14e   :  { %2196 = vmatpush1.bf16.msra.mxu0 %v2992_v15  ;;  %2228 = vmatpush1.bf16.msra.mxu1 %v2996_v19 }
 0x14f   :  { %2198 = vmatprep.subr.bf16.mxu0 %v3000_v24  ;;  %2230 = vmatprep.subr.bf16.mxu1 %v3004_v28 }
 0x152   :  { %2200 = vmatpush1.bf16.msra.mxu0 %v3011_v33  ;;  %2232 = vmatpush1.bf16.msra.mxu1 %v3015_v39 }
 0x153   :  { %2202 = vmatprep.subr.bf16.mxu0 %v3019_v43  ;;  %2234 = vmatprep.subr.bf16.mxu1 %v3023_v46 }
 0x156   :  { %2204 = vmatpush1.bf16.msra.mxu0 %v3030_v52  ;;  %2236 = vmatpush1.bf16.msra.mxu1 %v3034_v56 }
 0x157   :  { %2206 = vmatprep.subr.bf16.mxu0 %v3038_v60  ;;  %2238 = vmatprep.subr.bf16.mxu1 %v3042_v1 }
 0x15a   :  { %2208 = vmatpush1.bf16.msra.mxu0 %v3049_v4  ;;  %2240 = vmatpush1.bf16.msra.mxu1 %v3053_v6 }
 0x15b   :  { %2242 = vmatprep.subr.bf16.mxu0 %v2915_v17  ;;  %2274 = vmatprep.subr.bf16.mxu1 %v2917_v21 }
 0x210   :  { %v679_v23 = vpop.f32.mrb[2].mxu0  ;;  %v750_v26 = vpop.f32.mrb[2].mxu1 }
 0x211   :  { %v2587_v27 = vadd.f32 %v679_v23, %v3106_v14  ;;  %v681_v30 = vpop.f32.mrb[3].mxu0  ;;  %v752_v31 = vpop.f32.mrb[3].mxu1  ;;  %v2603_v41 = vadd.f32 %v750_v26, %v3112_v36  ;;  %v1962_v23 = vsel %vm425_vm1, 1.0, %v2835_v0 }
 0x212   :  { %v2588_v32 = vadd.f32 %v681_v30, %v3108_v16  ;;  %v2604_v45 = vadd.f32 %v752_v31, %v3115_v44  ;;  %v607_v30 = vmul.f32 %v1962_v23, %v3121_v20 }
 0x213   :  { %v1967_v37 = vmul.f32 -1.442695, %v2587_v27  ;;  %v1969_v48 = vmul.f32 -1.442695, %v2603_v41 }
 0x214   :  { %v1968_v40 = vmul.f32 -1.442695, %v2588_v32 }
 0x215   :  { %2672 = vpow2.f32 %v1967_v37 }
 0x216   :  { %2674 = vpow2.f32 %v1968_v40 }
 0x217   :  { %2676 = vtanh.f32 %v2604_v45 }
 0x218   :  { %2678 = vpow2.f32 %v1969_v48 }
 0x21f   :  { %v2673_v49 = vpop.eup %2672 }
 0x220   :  { %v768_v51 = vadd.f32 1.0, %v2673_v49  ;;  %v2675_v53 = vpop.eup %2674 }
 0x221   :  { %v769_v55 = vadd.f32 1.0, %v2675_v53  ;;  %v2677_v57 = vpop.eup %2676 }
 0x222   :  { %2680 = vrcp.f32 %v768_v51  ;;  %v2679_v59 = vpop.eup %2678 }
 0x223   :  { %2682 = vrcp.f32 %v769_v55  ;;  %v770_v9 = vadd.f32 1.0, %v2679_v59 }
 0x225   :  { %2684 = vrcp.f32 %v770_v9 }
 0x22c   :  { %v2681_v62 = vpop.eup %2680 }
 0x22d   :  { %v779_v63 = vmul.f32 %v2681_v62, %v2677_v57  ;;  %v2683_v3 = vpop.eup %2682 }
 0x22e   :  { %v778_v10 = vmul.f32 %v2683_v3, %v3118_v12 }
 0x22f   :  { %v2685_v26 = vpop.eup %2684 }
 0x230   :  { %v3164_v13 = vadd.f32 %v779_v63, %v778_v10 }
 0x232   :  { %2686 = vtanh.f32 %v3164_v13 }
 0x23c   :  { %v2687_v27 = vpop.eup %2686 }
 0x23d   :  { %v782_v31 = vmul.f32 %v2687_v27, %v2685_v26 }
 0x23f   :  { %v3173_v32 = vadd.f32 %v782_v31, %v607_v30  ;;  %853 = vmatmul.mubr.f32.vlgmr.msra.gmra.mrb[4].mxu0 %v782_v31  ;;  %924 = vmatmul.mubr.f32.vlgmr.msra.gmra.mrb[4].mxu1 %v782_v31 }
 0x240   :  { %2244 = vmatpush1.bf16.msra.mxu0 %v2919_v22  ;;  %2276 = vmatpush1.bf16.msra.mxu1 %v2922_v25 }
 0x241   :  { %2246 = vmatprep.subr.bf16.mxu0 %v2926_v29  ;;  %2278 = vmatprep.subr.bf16.mxu1 %v2933_v34 }
 0x242   :  { %1027 = vmatprep.mubr.f32.mxu0 %v2835_v0  ;;  %1098 = vmatprep.mubr.f32.mxu1 %v2835_v0 }
 0x244   :  { %2248 = vmatpush1.bf16.msra.mxu0 %v2935_v35  ;;  %2280 = vmatpush1.bf16.msra.mxu1 %v2939_v38 }
 0x245   :  { %2250 = vmatprep.subr.bf16.mxu0 %v2943_v42  ;;  %2282 = vmatprep.subr.bf16.mxu1 %v2950_v47 }
 0x248   :  { %2252 = vmatpush1.bf16.msra.mxu0 %v2954_v50  ;;  %2284 = vmatpush1.bf16.msra.mxu1 %v2958_v54 }
 0x249   :  { %2254 = vmatprep.subr.bf16.mxu0 %v2962_v58  ;;  %2286 = vmatprep.subr.bf16.mxu1 %v2966_v61 }
 0x24c   :  { %2256 = vmatpush1.bf16.msra.mxu0 %v2973_v2  ;;  %2288 = vmatpush1.bf16.msra.mxu1 %v2977_v5 }
 0x24d   :  { %2258 = vmatprep.subr.bf16.mxu0 %v2981_v8  ;;  %2290 = vmatprep.subr.bf16.mxu1 %v2985_v11 }
 0x250   :  { %2260 = vmatpush1.bf16.msra.mxu0 %v2992_v15  ;;  %2292 = vmatpush1.bf16.msra.mxu1 %v2996_v19 }
 0x251   :  { %2262 = vmatprep.subr.bf16.mxu0 %v3000_v24  ;;  %2294 = vmatprep.subr.bf16.mxu1 %v3004_v28 }
 0x254   :  { %2264 = vmatpush1.bf16.msra.mxu0 %v3011_v33  ;;  %2296 = vmatpush1.bf16.msra.mxu1 %v3015_v39 }
 0x255   :  { %2266 = vmatprep.subr.bf16.mxu0 %v3019_v43  ;;  %2298 = vmatprep.subr.bf16.mxu1 %v3023_v46 }
 0x258   :  { %2268 = vmatpush1.bf16.msra.mxu0 %v3030_v52  ;;  %2300 = vmatpush1.bf16.msra.mxu1 %v3034_v56 }
 0x259   :  { %2270 = vmatprep.subr.bf16.mxu0 %v3038_v60  ;;  %2302 = vmatprep.subr.bf16.mxu1 %v3042_v1 }
 0x25c   :  { %2272 = vmatpush1.bf16.msra.mxu0 %v3049_v4  ;;  %2304 = vmatpush1.bf16.msra.mxu1 %v3053_v6 }
 0x25d   :  { %2306 = vmatprep.subr.bf16.mxu0 %v2915_v17  ;;  %2338 = vmatprep.subr.bf16.mxu1 %v2917_v21 }
 0x312   :  { %v854_v7 = vpop.f32.mrb[4].mxu0  ;;  %v925_v12 = vpop.f32.mrb[4].mxu1 }
 0x313   :  { %v2589_v20 = vadd.f32 %v854_v7, %v3106_v14  ;;  %v856_v37 = vpop.f32.mrb[5].mxu0  ;;  %v927_v40 = vpop.f32.mrb[5].mxu1  ;;  %v2605_v49 = vadd.f32 %v925_v12, %v3112_v36 }
 0x314   :  { %v2590_v41 = vadd.f32 %v856_v37, %v3108_v16  ;;  %v2606_v51 = vadd.f32 %v927_v40, %v3115_v44 }
 0x315   :  { %v1970_v45 = vmul.f32 -1.442695, %v2589_v20  ;;  %v1972_v53 = vmul.f32 -1.442695, %v2605_v49 }
 0x316   :  { %v1971_v48 = vmul.f32 -1.442695, %v2590_v41 }
 0x317   :  { %2688 = vpow2.f32 %v1970_v45 }
 0x318   :  { %2690 = vpow2.f32 %v1971_v48 }
 0x319   :  { %2692 = vtanh.f32 %v2606_v51 }
 0x31a   :  { %2694 = vpow2.f32 %v1972_v53 }
 0x321   :  { %v2689_v55 = vpop.eup %2688 }
 0x322   :  { %v943_v57 = vadd.f32 1.0, %v2689_v55  ;;  %v2691_v59 = vpop.eup %2690 }
 0x323   :  { %v944_v62 = vadd.f32 1.0, %v2691_v59  ;;  %v2693_v63 = vpop.eup %2692 }
 0x324   :  { %2696 = vrcp.f32 %v943_v57  ;;  %v2695_v3 = vpop.eup %2694 }
 0x325   :  { %2698 = vrcp.f32 %v944_v62  ;;  %v945_v26 = vadd.f32 1.0, %v2695_v3 }
 0x327   :  { %2700 = vrcp.f32 %v945_v26 }
 0x32e   :  { %v2697_v9 = vpop.eup %2696 }
 0x32f   :  { %v954_v10 = vmul.f32 %v2697_v9, %v2693_v63  ;;  %v2699_v23 = vpop.eup %2698 }
 0x330   :  { %v953_v27 = vmul.f32 %v2699_v23, %v3164_v13 }
 0x331   :  { %v2701_v31 = vpop.eup %2700 }
 0x332   :  { %v3214_v30 = vadd.f32 %v954_v10, %v953_v27 }
 0x334   :  { %2702 = vtanh.f32 %v3214_v30 }
 0x33e   :  { %v2703_v7 = vpop.eup %2702 }
 0x33f   :  { %v957_v12 = vmul.f32 %v2703_v7, %v2701_v31 }
 0x341   :  { %v3218_v20 = vadd.f32 %v957_v12, %v3173_v32  ;;  %1028 = vmatmul.mubr.f32.vlgmr.msra.gmra.mrb[6].mxu0 %v957_v12  ;;  %1099 = vmatmul.mubr.f32.vlgmr.msra.gmra.mrb[6].mxu1 %v957_v12 }
 0x342   :  { %2308 = vmatpush1.bf16.msra.mxu0 %v2919_v22  ;;  %2340 = vmatpush1.bf16.msra.mxu1 %v2922_v25 }
 0x343   :  { %2310 = vmatprep.subr.bf16.mxu0 %v2926_v29  ;;  %2342 = vmatprep.subr.bf16.mxu1 %v2933_v34 }
 0x344   :  { %1202 = vmatprep.mubr.f32.mxu0 %v2835_v0  ;;  %1273 = vmatprep.mubr.f32.mxu1 %v2835_v0 }
 0x346   :  { %2312 = vmatpush1.bf16.msra.mxu0 %v2935_v35  ;;  %2344 = vmatpush1.bf16.msra.mxu1 %v2939_v38 }
 0x347   :  { %2314 = vmatprep.subr.bf16.mxu0 %v2943_v42  ;;  %2346 = vmatprep.subr.bf16.mxu1 %v2950_v47 }
 0x34a   :  { %2316 = vmatpush1.bf16.msra.mxu0 %v2954_v50  ;;  %2348 = vmatpush1.bf16.msra.mxu1 %v2958_v54 }
 0x34b   :  { %2318 = vmatprep.subr.bf16.mxu0 %v2962_v58  ;;  %2350 = vmatprep.subr.bf16.mxu1 %v2966_v61 }
 0x34e   :  { %2320 = vmatpush1.bf16.msra.mxu0 %v2973_v2  ;;  %2352 = vmatpush1.bf16.msra.mxu1 %v2977_v5 }
 0x34f   :  { %2322 = vmatprep.subr.bf16.mxu0 %v2981_v8  ;;  %2354 = vmatprep.subr.bf16.mxu1 %v2985_v11 }
 0x352   :  { %2324 = vmatpush1.bf16.msra.mxu0 %v2992_v15  ;;  %2356 = vmatpush1.bf16.msra.mxu1 %v2996_v19 }
 0x353   :  { %2326 = vmatprep.subr.bf16.mxu0 %v3000_v24  ;;  %2358 = vmatprep.subr.bf16.mxu1 %v3004_v28 }
 0x356   :  { %2328 = vmatpush1.bf16.msra.mxu0 %v3011_v33  ;;  %2360 = vmatpush1.bf16.msra.mxu1 %v3015_v39 }
 0x357   :  { %2330 = vmatprep.subr.bf16.mxu0 %v3019_v43  ;;  %2362 = vmatprep.subr.bf16.mxu1 %v3023_v46 }
 0x35a   :  { %2332 = vmatpush1.bf16.msra.mxu0 %v3030_v52  ;;  %2364 = vmatpush1.bf16.msra.mxu1 %v3034_v56 }
 0x35b   :  { %2334 = vmatprep.subr.bf16.mxu0 %v3038_v60  ;;  %2366 = vmatprep.subr.bf16.mxu1 %v3042_v1 }
 0x35e   :  { %2336 = vmatpush1.bf16.msra.mxu0 %v3049_v4  ;;  %2368 = vmatpush1.bf16.msra.mxu1 %v3053_v6 }
 0x35f   :  { %2370 = vmatprep.subr.bf16.mxu0 %v2915_v17  ;;  %2402 = vmatprep.subr.bf16.mxu1 %v2917_v21 }
 0x414   :  { %v1029_v13 = vpop.f32.mrb[6].mxu0  ;;  %v1100_v32 = vpop.f32.mrb[6].mxu1 }
 0x415   :  { %v2591_v37 = vadd.f32 %v1029_v13, %v3106_v14  ;;  %v1031_v40 = vpop.f32.mrb[7].mxu0  ;;  %v1102_v41 = vpop.f32.mrb[7].mxu1  ;;  %v2607_v51 = vadd.f32 %v1100_v32, %v3112_v36 }
 0x416   :  { %v2592_v45 = vadd.f32 %v1031_v40, %v3108_v16  ;;  %v2608_v53 = vadd.f32 %v1102_v41, %v3115_v44 }
 0x417   :  { %v1973_v48 = vmul.f32 -1.442695, %v2591_v37  ;;  %v1975_v55 = vmul.f32 -1.442695, %v2607_v51 }
 0x418   :  { %v1974_v49 = vmul.f32 -1.442695, %v2592_v45 }
 0x419   :  { %2704 = vpow2.f32 %v1973_v48 }
 0x41a   :  { %2706 = vpow2.f32 %v1974_v49 }
 0x41b   :  { %2708 = vtanh.f32 %v2608_v53 }
 0x41c   :  { %2710 = vpow2.f32 %v1975_v55 }
 0x423   :  { %v2705_v57 = vpop.eup %2704 }
 0x424   :  { %v1118_v59 = vadd.f32 1.0, %v2705_v57  ;;  %v2707_v62 = vpop.eup %2706 }
 0x425   :  { %v1119_v63 = vadd.f32 1.0, %v2707_v62  ;;  %v2709_v3 = vpop.eup %2708 }
 0x426   :  { %2712 = vrcp.f32 %v1118_v59  ;;  %v2711_v9 = vpop.eup %2710 }
 0x427   :  { %2714 = vrcp.f32 %v1119_v63  ;;  %v1120_v27 = vadd.f32 1.0, %v2711_v9 }
 0x429   :  { %2716 = vrcp.f32 %v1120_v27 }
 0x430   :  { %v2713_v10 = vpop.eup %2712 }
 0x431   :  { %v1129_v23 = vmul.f32 %v2713_v10, %v2709_v3  ;;  %v2715_v26 = vpop.eup %2714 }
 0x432   :  { %v1128_v31 = vmul.f32 %v2715_v26, %v3214_v30 }
 0x433   :  { %v2717_v12 = vpop.eup %2716 }
 0x434   :  { %v3259_v7 = vadd.f32 %v1129_v23, %v1128_v31 }
 0x436   :  { %2718 = vtanh.f32 %v3259_v7 }
 0x440   :  { %v2719_v13 = vpop.eup %2718 }
 0x441   :  { %v1132_v32 = vmul.f32 %v2719_v13, %v2717_v12 }
 0x443   :  { %v3263_v37 = vadd.f32 %v1132_v32, %v3218_v20  ;;  %1203 = vmatmul.mubr.f32.vlgmr.msra.gmra.mrb[8].mxu0 %v1132_v32  ;;  %1274 = vmatmul.mubr.f32.vlgmr.msra.gmra.mrb[8].mxu1 %v1132_v32 }
 0x444   :  { %2372 = vmatpush1.bf16.msra.mxu0 %v2919_v22  ;;  %2404 = vmatpush1.bf16.msra.mxu1 %v2922_v25 }
 0x445   :  { %2374 = vmatprep.subr.bf16.mxu0 %v2926_v29  ;;  %2406 = vmatprep.subr.bf16.mxu1 %v2933_v34 }
 0x446   :  { %1377 = vmatprep.mubr.f32.mxu0 %v2835_v0  ;;  %1448 = vmatprep.mubr.f32.mxu1 %v2835_v0 }
 0x448   :  { %2376 = vmatpush1.bf16.msra.mxu0 %v2935_v35  ;;  %2408 = vmatpush1.bf16.msra.mxu1 %v2939_v38 }
 0x449   :  { %2378 = vmatprep.subr.bf16.mxu0 %v2943_v42  ;;  %2410 = vmatprep.subr.bf16.mxu1 %v2950_v47 }
 0x44c   :  { %2380 = vmatpush1.bf16.msra.mxu0 %v2954_v50  ;;  %2412 = vmatpush1.bf16.msra.mxu1 %v2958_v54 }
 0x44d   :  { %2382 = vmatprep.subr.bf16.mxu0 %v2962_v58  ;;  %2414 = vmatprep.subr.bf16.mxu1 %v2966_v61 }
 0x450   :  { %2384 = vmatpush1.bf16.msra.mxu0 %v2973_v2  ;;  %2416 = vmatpush1.bf16.msra.mxu1 %v2977_v5 }
 0x451   :  { %2386 = vmatprep.subr.bf16.mxu0 %v2981_v8  ;;  %2418 = vmatprep.subr.bf16.mxu1 %v2985_v11 }
 0x454   :  { %2388 = vmatpush1.bf16.msra.mxu0 %v2992_v15  ;;  %2420 = vmatpush1.bf16.msra.mxu1 %v2996_v19 }
 0x455   :  { %2390 = vmatprep.subr.bf16.mxu0 %v3000_v24  ;;  %2422 = vmatprep.subr.bf16.mxu1 %v3004_v28 }
 0x458   :  { %2392 = vmatpush1.bf16.msra.mxu0 %v3011_v33  ;;  %2424 = vmatpush1.bf16.msra.mxu1 %v3015_v39 }
 0x459   :  { %2394 = vmatprep.subr.bf16.mxu0 %v3019_v43  ;;  %2426 = vmatprep.subr.bf16.mxu1 %v3023_v46 }
 0x45c   :  { %2396 = vmatpush1.bf16.msra.mxu0 %v3030_v52  ;;  %2428 = vmatpush1.bf16.msra.mxu1 %v3034_v56 }
 0x45d   :  { %2398 = vmatprep.subr.bf16.mxu0 %v3038_v60  ;;  %2430 = vmatprep.subr.bf16.mxu1 %v3042_v1 }
 0x460   :  { %2400 = vmatpush1.bf16.msra.mxu0 %v3049_v4  ;;  %2432 = vmatpush1.bf16.msra.mxu1 %v3053_v6 }
 0x461   :  { %2434 = vmatprep.subr.bf16.mxu0 %v2915_v17  ;;  %2466 = vmatprep.subr.bf16.mxu1 %v2917_v21 }
 0x516   :  { %v1204_v30 = vpop.f32.mrb[8].mxu0  ;;  %v1275_v20 = vpop.f32.mrb[8].mxu1 }
 0x517   :  { %v2593_v40 = vadd.f32 %v1204_v30, %v3106_v14  ;;  %v1206_v41 = vpop.f32.mrb[9].mxu0  ;;  %v1277_v45 = vpop.f32.mrb[9].mxu1  ;;  %v2609_v53 = vadd.f32 %v1275_v20, %v3112_v36 }
 0x518   :  { %v2594_v48 = vadd.f32 %v1206_v41, %v3108_v16  ;;  %v2610_v55 = vadd.f32 %v1277_v45, %v3115_v44 }
 0x519   :  { %v1976_v49 = vmul.f32 -1.442695, %v2593_v40  ;;  %v1978_v57 = vmul.f32 -1.442695, %v2609_v53 }
 0x51a   :  { %v1977_v51 = vmul.f32 -1.442695, %v2594_v48 }
 0x51b   :  { %2720 = vpow2.f32 %v1976_v49 }
 0x51c   :  { %2722 = vpow2.f32 %v1977_v51 }
 0x51d   :  { %2724 = vtanh.f32 %v2610_v55 }
 0x51e   :  { %2726 = vpow2.f32 %v1978_v57 }
 0x525   :  { %v2721_v59 = vpop.eup %2720 }
 0x526   :  { %v1293_v62 = vadd.f32 1.0, %v2721_v59  ;;  %v2723_v63 = vpop.eup %2722 }
 0x527   :  { %v1294_v3 = vadd.f32 1.0, %v2723_v63  ;;  %v2725_v9 = vpop.eup %2724 }
 0x528   :  { %2728 = vrcp.f32 %v1293_v62  ;;  %v2727_v10 = vpop.eup %2726 }
 0x529   :  { %2730 = vrcp.f32 %v1294_v3  ;;  %v1295_v31 = vadd.f32 1.0, %v2727_v10 }
 0x52b   :  { %2732 = vrcp.f32 %v1295_v31 }
 0x532   :  { %v2729_v23 = vpop.eup %2728 }
 0x533   :  { %v1304_v26 = vmul.f32 %v2729_v23, %v2725_v9  ;;  %v2731_v27 = vpop.eup %2730 }
 0x534   :  { %v1303_v12 = vmul.f32 %v2731_v27, %v3259_v7 }
 0x535   :  { %v2733_v32 = vpop.eup %2732 }
 0x536   :  { %v3304_v13 = vadd.f32 %v1304_v26, %v1303_v12 }
 0x538   :  { %2734 = vtanh.f32 %v3304_v13 }
 0x542   :  { %v2735_v30 = vpop.eup %2734 }
 0x543   :  { %v1307_v20 = vmul.f32 %v2735_v30, %v2733_v32 }
 0x545   :  { %v3308_v40 = vadd.f32 %v1307_v20, %v3263_v37  ;;  %1378 = vmatmul.mubr.f32.vlgmr.msra.gmra.mrb[10].mxu0 %v1307_v20  ;;  %1449 = vmatmul.mubr.f32.vlgmr.msra.gmra.mrb[10].mxu1 %v1307_v20 }
 0x546   :  { %2436 = vmatpush1.bf16.msra.mxu0 %v2919_v22  ;;  %2468 = vmatpush1.bf16.msra.mxu1 %v2922_v25 }
 0x547   :  { %2438 = vmatprep.subr.bf16.mxu0 %v2926_v29  ;;  %2470 = vmatprep.subr.bf16.mxu1 %v2933_v34 }
 0x548   :  { %1552 = vmatprep.mubr.f32.mxu0 %v2835_v0  ;;  %1623 = vmatprep.mubr.f32.mxu1 %v2835_v0 }
 0x54a   :  { %2440 = vmatpush1.bf16.msra.mxu0 %v2935_v35  ;;  %2472 = vmatpush1.bf16.msra.mxu1 %v2939_v38 }
 0x54b   :  { %2442 = vmatprep.subr.bf16.mxu0 %v2943_v42  ;;  %2474 = vmatprep.subr.bf16.mxu1 %v2950_v47 }
 0x54e   :  { %2444 = vmatpush1.bf16.msra.mxu0 %v2954_v50  ;;  %2476 = vmatpush1.bf16.msra.mxu1 %v2958_v54 }
 0x54f   :  { %2446 = vmatprep.subr.bf16.mxu0 %v2962_v58  ;;  %2478 = vmatprep.subr.bf16.mxu1 %v2966_v61 }
 0x552   :  { %2448 = vmatpush1.bf16.msra.mxu0 %v2973_v2  ;;  %2480 = vmatpush1.bf16.msra.mxu1 %v2977_v5 }
 0x553   :  { %2450 = vmatprep.subr.bf16.mxu0 %v2981_v8  ;;  %2482 = vmatprep.subr.bf16.mxu1 %v2985_v11 }
 0x556   :  { %2452 = vmatpush1.bf16.msra.mxu0 %v2992_v15  ;;  %2484 = vmatpush1.bf16.msra.mxu1 %v2996_v19 }
 0x557   :  { %2454 = vmatprep.subr.bf16.mxu0 %v3000_v24  ;;  %2486 = vmatprep.subr.bf16.mxu1 %v3004_v28 }
 0x55a   :  { %2456 = vmatpush1.bf16.msra.mxu0 %v3011_v33  ;;  %2488 = vmatpush1.bf16.msra.mxu1 %v3015_v39 }
 0x55b   :  { %2458 = vmatprep.subr.bf16.mxu0 %v3019_v43  ;;  %2490 = vmatprep.subr.bf16.mxu1 %v3023_v46 }
 0x55e   :  { %2460 = vmatpush1.bf16.msra.mxu0 %v3030_v52  ;;  %2492 = vmatpush1.bf16.msra.mxu1 %v3034_v56 }
 0x55f   :  { %2462 = vmatprep.subr.bf16.mxu0 %v3038_v60  ;;  %2494 = vmatprep.subr.bf16.mxu1 %v3042_v1 }
 0x562   :  { %2464 = vmatpush1.bf16.msra.mxu0 %v3049_v4  ;;  %2496 = vmatpush1.bf16.msra.mxu1 %v3053_v6 }
 0x563   :  { %2498 = vmatprep.subr.bf16.mxu0 %v2915_v17  ;;  %2530 = vmatprep.subr.bf16.mxu1 %v2917_v21 }
 0x618   :  { %v1379_v7 = vpop.f32.mrb[10].mxu0  ;;  %v1450_v37 = vpop.f32.mrb[10].mxu1 }
 0x619   :  { %v2595_v41 = vadd.f32 %v1379_v7, %v3106_v14  ;;  %v1381_v45 = vpop.f32.mrb[11].mxu0  ;;  %v1452_v48 = vpop.f32.mrb[11].mxu1  ;;  %v2611_v55 = vadd.f32 %v1450_v37, %v3112_v36  ;;  %v1839_v37 = vld [vmem:[%s3475_s4 + $0x18] sm:$0xff] }
 0x61a   :  { %v2596_v49 = vadd.f32 %v1381_v45, %v3108_v16  ;;  %v2612_v57 = vadd.f32 %v1452_v48, %v3115_v44  ;;  %v1840_v45 = vld [vmem:[%s3475_s4 + $0x20] sm:$0xff]  ;;  %v1841_v48 = vld [vmem:[%s3475_s4 + $0x28] sm:$0xff] }
 0x61b   :  { %v1979_v51 = vmul.f32 -1.442695, %v2595_v41  ;;  %v1981_v59 = vmul.f32 -1.442695, %v2611_v55 }
 0x61c   :  { %v1980_v53 = vmul.f32 -1.442695, %v2596_v49  ;;  %v2568_v49 = vpack.c.bf16 %v1841_v48, %v1840_v45 }
 0x61d   :  { %2736 = vpow2.f32 %v1979_v51  ;;  %v1842_v51 = vld [vmem:[%s3475_s4 + $0x30] sm:$0xff] }
 0x61e   :  { %2738 = vpow2.f32 %v1980_v53  ;;  %v1843_v53 = vld [vmem:[%s3475_s4 + $0x38] sm:$0xff] }
 0x61f   :  { %2740 = vtanh.f32 %v2612_v57  ;;  %v2571_v55 = vpack.c.bf16 %v1843_v53, %v1842_v51  ;;  %v1844_v57 = vld [vmem:[%s3475_s4 + $0x40] sm:$0xff] }
 0x620   :  { %2742 = vpow2.f32 %v1981_v59  ;;  %v1845_v59 = vld [vmem:[%s3475_s4 + $0x48] sm:$0xff] }
 0x627   :  { %v2737_v17 = vpop.eup %2736 }
 0x628   :  { %v1468_v62 = vadd.f32 1.0, %v2737_v17  ;;  %v2739_v21 = vpop.eup %2738  ;;  %v2574_v17 = vpack.c.bf16 %v1845_v59, %v1844_v57 }
 0x629   :  { %v1469_v63 = vadd.f32 1.0, %v2739_v21  ;;  %v2741_v3 = vpop.eup %2740  ;;  %v1847_v21 = vld [vmem:[%s3475_s4 + $0x58] sm:$0xff] }
 0x62a   :  { %2744 = vrcp.f32 %v1468_v62  ;;  %v2743_v9 = vpop.eup %2742  ;;  %v1846_v62 = vld [vmem:[%s3475_s4 + $0x50] sm:$0xff] }
 0x62b   :  { %2746 = vrcp.f32 %v1469_v63  ;;  %v1470_v27 = vadd.f32 1.0, %v2743_v9  ;;  %v2577_v63 = vpack.c.bf16 %v1847_v21, %v1846_v62  ;;  %v1849_v9 = vld [vmem:[%s3475_s4 + $0x68] sm:$0xff] }
 0x62d   :  { %2748 = vrcp.f32 %v1470_v27 }
 0x634   :  { %v2745_v10 = vpop.eup %2744 }
 0x635   :  { %v1479_v23 = vmul.f32 %v2745_v10, %v2741_v3  ;;  %v2747_v26 = vpop.eup %2746  ;;  %v1848_v3 = vld [vmem:[%s3475_s4 + $0x60] sm:$0xff] }
 0x636   :  { %v1478_v31 = vmul.f32 %v2747_v26, %v3304_v13  ;;  %v2836_v13 = vmov 0.0|0.0   ;;  %v2580_v10 = vpack.c.bf16 %v1849_v9, %v1848_v3  ;;  %v1851_v26 = vld [vmem:[%s3475_s4 + $0x78] sm:$0xff] }
 0x637   :  { %v2749_v32 = vpop.eup %2748 }
 0x638   :  { %v3349_v12 = vadd.f32 %v1479_v23, %v1478_v31  ;;  %v1850_v23 = vld [vmem:[%s3475_s4 + $0x70] sm:$0xff] }
 0x639   :  { %v2583_v27 = vpack.c.bf16 %v1851_v26, %v1850_v23 }
 0x63a   :  { %2750 = vtanh.f32 %v3349_v12 }
 0x644   :  { %v2751_v30 = vpop.eup %2750 }
 0x645   :  { %v1482_v20 = vmul.f32 %v2751_v30, %v2749_v32 }
 0x647   :  { %1553 = vmatmul.mubr.f32.vlgmr.msra.gmra.mrb[12].mxu0 %v1482_v20  ;;  %1624 = vmatmul.mubr.f32.vlgmr.msra.gmra.mrb[12].mxu1 %v1482_v20  ;;  %v3353_v7 = vadd.f32 %v1482_v20, %v3308_v40  ;;  %v1838_v40 = vld [vmem:[%s3475_s4 + $0x10] sm:$0xff] }
 0x648   :  { %2500 = vmatpush1.bf16.msra.mxu0 %v2919_v22  ;;  %2532 = vmatpush1.bf16.msra.mxu1 %v2922_v25  ;;  %v2565_v41 = vpack.c.bf16 %v1839_v37, %v1838_v40 }
 0x649   :  { %2502 = vmatprep.subr.bf16.mxu0 %v2926_v29  ;;  %2534 = vmatprep.subr.bf16.mxu1 %v2933_v34 }
 0x64a   :  { %1727 = vmatprep.mubr.f32.mxu0 %v2835_v0  ;;  %1798 = vmatprep.mubr.f32.mxu1 %v2835_v0 }
 0x64c   :  { %2504 = vmatpush1.bf16.msra.mxu0 %v2935_v35  ;;  %2536 = vmatpush1.bf16.msra.mxu1 %v2939_v38 }
 0x64d   :  { %2506 = vmatprep.subr.bf16.mxu0 %v2943_v42  ;;  %2538 = vmatprep.subr.bf16.mxu1 %v2950_v47 }
 0x650   :  { %2508 = vmatpush1.bf16.msra.mxu0 %v2954_v50  ;;  %2540 = vmatpush1.bf16.msra.mxu1 %v2958_v54 }
 0x651   :  { %2510 = vmatprep.subr.bf16.mxu0 %v2962_v58  ;;  %2542 = vmatprep.subr.bf16.mxu1 %v2966_v61 }
 0x654   :  { %2512 = vmatpush1.bf16.msra.mxu0 %v2973_v2  ;;  %2544 = vmatpush1.bf16.msra.mxu1 %v2977_v5 }
 0x655   :  { %2514 = vmatprep.subr.bf16.mxu0 %v2981_v8  ;;  %2546 = vmatprep.subr.bf16.mxu1 %v2985_v11 }
 0x658   :  { %2516 = vmatpush1.bf16.msra.mxu0 %v2992_v15  ;;  %2548 = vmatpush1.bf16.msra.mxu1 %v2996_v19 }
 0x659   :  { %2518 = vmatprep.subr.bf16.mxu0 %v3000_v24  ;;  %2550 = vmatprep.subr.bf16.mxu1 %v3004_v28 }
 0x65c   :  { %2520 = vmatpush1.bf16.msra.mxu0 %v3011_v33  ;;  %2552 = vmatpush1.bf16.msra.mxu1 %v3015_v39 }
 0x65d   :  { %2522 = vmatprep.subr.bf16.mxu0 %v3019_v43  ;;  %2554 = vmatprep.subr.bf16.mxu1 %v3023_v46 }
 0x660   :  { %2524 = vmatpush1.bf16.msra.mxu0 %v3030_v52  ;;  %2556 = vmatpush1.bf16.msra.mxu1 %v3034_v56 }
 0x661   :  { %2526 = vmatprep.subr.bf16.mxu0 %v3038_v60  ;;  %2558 = vmatprep.subr.bf16.mxu1 %v3042_v1  ;;  %v1836_v1 = vld [vmem:[%s3475_s4] sm:$0xff] }
 0x664   :  { %2528 = vmatpush1.bf16.msra.mxu0 %v3049_v4  ;;  %2560 = vmatpush1.bf16.msra.mxu1 %v3053_v6  ;;  %v1837_v4 = vld [vmem:[%s3475_s4 + $0x8] sm:$0xff] }
 0x665   :  { %v2562_v6 = vpack.c.bf16 %v1837_v4, %v1836_v1  ;;  %2561 = vmatprep.subr.bf16.mxu0 %v2836_v13 }
 0x71a   :  { %v1554_v22 = vpop.f32.mrb[12].mxu0  ;;  %v1625_v25 = vpop.f32.mrb[12].mxu1 }
 0x71b   :  { %v2597_v29 = vadd.f32 %v1554_v22, %v3106_v14  ;;  %v1556_v34 = vpop.f32.mrb[13].mxu0  ;;  %v1627_v35 = vpop.f32.mrb[13].mxu1  ;;  %v2613_v50 = vadd.f32 %v1625_v25, %v3112_v36 }
 0x71c   :  { %v2598_v38 = vadd.f32 %v1556_v34, %v3108_v16  ;;  %v2614_v54 = vadd.f32 %v1627_v35, %v3115_v44 }
 0x71d   :  { %v1982_v42 = vmul.f32 -1.442695, %v2597_v29  ;;  %v1984_v58 = vmul.f32 -1.442695, %v2613_v50 }
 0x71e   :  { %v1983_v47 = vmul.f32 -1.442695, %v2598_v38 }
 0x71f   :  { %2752 = vpow2.f32 %v1982_v42 }
 0x720   :  { %2754 = vpow2.f32 %v1983_v47 }
 0x721   :  { %2756 = vtanh.f32 %v2614_v54 }
 0x722   :  { %2758 = vpow2.f32 %v1984_v58 }
 0x729   :  { %v2753_v61 = vpop.eup %2752 }
 0x72a   :  { %v1643_v2 = vadd.f32 1.0, %v2753_v61  ;;  %v2755_v5 = vpop.eup %2754 }
 0x72b   :  { %v1644_v8 = vadd.f32 1.0, %v2755_v5  ;;  %v2757_v11 = vpop.eup %2756 }
 0x72c   :  { %2760 = vrcp.f32 %v1643_v2  ;;  %v2759_v15 = vpop.eup %2758 }
 0x72d   :  { %2762 = vrcp.f32 %v1644_v8  ;;  %v1645_v33 = vadd.f32 1.0, %v2759_v15 }
 0x72f   :  { %2764 = vrcp.f32 %v1645_v33  ;;  %v1988_v33 = vld [vmem:[%s3476_s5] ss:$0 sm:$0xff] }
 0x736   :  { %v2761_v19 = vpop.eup %2760 }
 0x737   :  { %v1654_v24 = vmul.f32 %v2761_v19, %v2757_v11  ;;  %v2763_v28 = vpop.eup %2762  ;;  %v1963_v11 = vsel %vm430_vm5, 1.0, %v2835_v0 }
 0x738   :  { %v1653_v39 = vmul.f32 %v2763_v28, %v3349_v12 }
 0x739   :  { %v2765_v46 = vpop.eup %2764 }
 0x73a   :  { %v3392_v43 = vadd.f32 %v1654_v24, %v1653_v39 }
 0x73c   :  { %2766 = vtanh.f32 %v3392_v43 }
 0x746   :  { %v2767_v52 = vpop.eup %2766 }
 0x747   :  { %v1657_v56 = vmul.f32 %v2767_v52, %v2765_v46 }
 0x749   :  { %1728 = vmatmul.mubr.f32.vlgmr.msra.gmra.mrb[14].mxu0 %v1657_v56  ;;  %1799 = vmatmul.mubr.f32.vlgmr.msra.gmra.mrb[14].mxu1 %v1657_v56  ;;  %v3396_v60 = vadd.f32 %v1657_v56, %v3353_v7 }
 0x74a   :  { %2563 = vmatpush3.bf16.msra.mxu0 %v2562_v6  ;;  %2038 = vmatprep.mubr.msk.f32.mxu0 %vm2837_vm2, %v2835_v0 }
 0x74b   :  { %2564 = vmatprep.subr.bf16.mxu0 %v2836_v13 }
 0x74e   :  { %2566 = vmatpush3.bf16.msra.mxu0 %v2565_v41 }
 0x74f   :  { %2567 = vmatprep.subr.bf16.mxu0 %v2836_v13 }
 0x752   :  { %2569 = vmatpush3.bf16.msra.mxu0 %v2568_v49 }
 0x753   :  { %2570 = vmatprep.subr.bf16.mxu0 %v2836_v13 }
 0x756   :  { %2572 = vmatpush3.bf16.msra.mxu0 %v2571_v55 }
 0x757   :  { %2573 = vmatprep.subr.bf16.mxu0 %v2836_v13 }
 0x75a   :  { %2575 = vmatpush3.bf16.msra.mxu0 %v2574_v17 }
 0x75b   :  { %2576 = vmatprep.subr.bf16.mxu0 %v2836_v13 }
 0x75e   :  { %2578 = vmatpush3.bf16.msra.mxu0 %v2577_v63 }
 0x75f   :  { %2579 = vmatprep.subr.bf16.mxu0 %v2836_v13 }
 0x762   :  { %2581 = vmatpush3.bf16.msra.mxu0 %v2580_v10 }
 0x763   :  { %2582 = vmatprep.subr.bf16.mxu0 %v2836_v13 }
 0x766   :  { %2584 = vmatpush3.bf16.msra.mxu0 %v2583_v27 }
 0x81c   :  { %v1729_v31 = vpop.f32.mrb[14].mxu0  ;;  %v1800_v12 = vpop.f32.mrb[14].mxu1 }
 0x81d   :  { %v2599_v32 = vadd.f32 %v1729_v31, %v3106_v14  ;;  %v1731_v30 = vpop.f32.mrb[15].mxu0  ;;  %v1802_v20 = vpop.f32.mrb[15].mxu1  ;;  %v2615_v29 = vadd.f32 %v1800_v12, %v3112_v36 }
 0x81e   :  { %v2600_v7 = vadd.f32 %v1731_v30, %v3108_v16  ;;  %v2616_v34 = vadd.f32 %v1802_v20, %v3115_v44 }
 0x81f   :  { %v1985_v22 = vmul.f32 -1.442695, %v2599_v32  ;;  %v1987_v35 = vmul.f32 -1.442695, %v2615_v29 }
 0x820   :  { %v1986_v25 = vmul.f32 -1.442695, %v2600_v7 }
 0x821   :  { %2768 = vpow2.f32 %v1985_v22 }
 0x822   :  { %2770 = vpow2.f32 %v1986_v25 }
 0x823   :  { %2772 = vtanh.f32 %v2616_v34 }
 0x824   :  { %2774 = vpow2.f32 %v1987_v35 }
 0x82b   :  { %v2769_v38 = vpop.eup %2768 }
 0x82c   :  { %v1818_v42 = vadd.f32 1.0, %v2769_v38  ;;  %v2771_v47 = vpop.eup %2770 }
 0x82d   :  { %v1819_v14 = vadd.f32 1.0, %v2771_v47  ;;  %v2773_v50 = vpop.eup %2772 }
 0x82e   :  { %2776 = vrcp.f32 %v1818_v42  ;;  %v2775_v54 = vpop.eup %2774 }
 0x82f   :  { %2778 = vrcp.f32 %v1819_v14  ;;  %v1820_v2 = vadd.f32 1.0, %v2775_v54 }
 0x831   :  { %2780 = vrcp.f32 %v1820_v2 }
 0x838   :  { %v2777_v16 = vpop.eup %2776 }
 0x839   :  { %v1829_v58 = vmul.f32 %v2777_v16, %v2773_v50  ;;  %v2779_v61 = vpop.eup %2778 }
 0x83a   :  { %v1828_v5 = vmul.f32 %v2779_v61, %v3392_v43 }
 0x83b   :  { %v2781_v44 = vpop.eup %2780 }
 0x83c   :  { %v1830_v36 = vadd.f32 %v1829_v58, %v1828_v5 }
 0x83e   :  { %2782 = vtanh.f32 %v1830_v36 }
 0x848   :  { %v2783_v8 = vpop.eup %2782 }
 0x849   :  { %v1832_v15 = vmul.f32 %v2783_v8, %v2781_v44 }
 0x84b   :  { %v1833_v19 = vmul.f32 %v1963_v11, %v1832_v15 }
 0x84d   :  { %v1834_v24 = vadd.f32 %v1833_v19, %v3396_v60 }
 0x84f   :  { %v1835_v28 = vmul.f32 0.14285715, %v1834_v24 }
 0x851   :  { %2039 = vmatmul.mubr.f32.vlgmr.msra.gmra.mrb[16].mxu0 %v1835_v28 }
 0x924   :  { %v1925_v39 = vpop.f32.mrb[16].mxu0 }
 0x925   :  { %v1926_v18 = vadd.f32 %v1988_v33, %v1925_v39  ;;  %v2040_v43 = vpop.f32.mrb[17].mxu0 }
 0x927   :  { %1930 = vst.msk [vmem:[#allocation6] sm:$0xff] %vm1929_vm6, %v1926_v18 }
 0x928   :  { %2817 = shalt.err (!%p2814_p12)
}
 0x929   :  { %s2818_s26 = scalar_lea.hbm %s3477_s6, 128 }
 0x92a   :  { %p2819_p13 = scmp.ne.s32.totalorder %s3477_s6, %s2818_s26  ;;  %p2822_p0 = scmp.lt.u32.totalorder %s2818_s26, %s3477_s6 }
 0x92c   :  { %p2824_p1 = pnand %p2822_p0, %p2819_p13 }
 0x92e   :  { %2827 = shalt.err (!%p2824_p1)
}
 0x92f   :  { %1940 = dma.vmem_to_hbm [thread:$0]  %s1938_s22, 128, %s3477_s6, [#allocation5]  }
 0x930   :  { %2830 = dma.done.wait [#allocation5], 128  }
 0x931   :  { %2831 = vsyncadd [#allocation5], 4294967168 }
 0x932   :  { %1944 = vsyncpa [#allocation4], 1 }
 0x933   :  { %1945 = vsyncpa [#allocation5], 1 }

</bundles_post_ra>
